<compile_context>
chip_gen: v7x
topology: tpu7x:2x2x1
jax: 0.10.0
libtpu: 0.0.40
codegen_flags: <defaults>
</compile_context>

<pallas_src>
import functools
import math

import jax
import jax.numpy as jnp
from jax import lax
from jax.experimental import pallas as pl
from jax.experimental.pallas import tpu as pltpu


# ----------------------------------------------------------------------------
# Fused whole-model kernel: one (batch-block, layer) pair per grid step
# ----------------------------------------------------------------------------

def _transformer_kernel(
    x_ref, pos_ref, w_in_ref, b_in_ref,
    w_qkv_ref, b_qkv_ref, w_o_ref, b_o_ref,
    w1_ref, b1_ref, w2_ref, b2_ref,
    g1_ref, be1_ref, g2_ref, be2_ref,
    w_cls_ref, b_cls_ref,
    out_ref,
    h_ref,                                   # VMEM scratch: (Bt*S, H) f32 residual
    *, num_heads, head_dim, eps=1e-5):
    layer = pl.program_id(1)
    num_layers = pl.num_programs(1)
    Bt, S, I = x_ref.shape
    H = num_heads * head_dim

    def bf16(a):
        return a.astype(jnp.bfloat16)

    def layernorm(s, g, b):
        # f32 statistics (keeps parity with the f32 PyTorch reference).
        mu = jnp.mean(s, axis=-1, keepdims=True)
        var = jnp.mean(jnp.square(s - mu), axis=-1, keepdims=True)
        return (s - mu) * lax.rsqrt(var + eps) * g + b

    # ---- l == 0: input projection + positional encoding into carried scratch ----
    @pl.when(layer == 0)
    def _():
        xf = bf16(x_ref[...].reshape(Bt * S, I))
        h0 = jnp.dot(xf, w_in_ref[...],
                     preferred_element_type=jnp.float32) + b_in_ref[...]
        h0 = h0.reshape(Bt, S, H) + pos_ref[...]          # pos broadcast over Bt
        h_ref[...] = h0.reshape(Bt * S, H)

    h = h_ref[...]                                        # (Bt*S, H) f32

    # ---- multi-head self-attention -----------------------------------------
    # Fused QKV: one lane-dense (Bt*S, H) x (H, 3H) matmul; 1/sqrt(hd) already
    # folded into the q-third of w_qkv / b_qkv at init.
    hb = bf16(h)
    qkv = jnp.dot(hb, w_qkv_ref[...],
                  preferred_element_type=jnp.float32) + b_qkv_ref[...]
    q = bf16(qkv[:, 0 * H:1 * H]).reshape(Bt, S, H)
    k = bf16(qkv[:, 1 * H:2 * H]).reshape(Bt, S, H)
    v = bf16(qkv[:, 2 * H:3 * H]).reshape(Bt, S, H)

    # Per-head score / AV matmuls: static loop (nh is a small compile-time
    # constant), single-batch-dim einsums over Bt. Softmax stays f32.
    heads = []
    for hh in range(num_heads):
        sl = slice(hh * head_dim, (hh + 1) * head_dim)
        s = jnp.einsum('bqd,bkd->bqk', q[:, :, sl], k[:, :, sl],
                       preferred_element_type=jnp.float32)
        s = s - jnp.max(s, axis=-1, keepdims=True)
        p = jnp.exp(s)
        # approx reciprocal on the EUP slot; documented non-bit-exact vs f32 ref
        p = p * pl.reciprocal(jnp.sum(p, axis=-1, keepdims=True), approx=True)
        heads.append(jnp.einsum('bqk,bkd->bqd', bf16(p), v[:, :, sl],
                                preferred_element_type=jnp.float32))
    o = jnp.concatenate(heads, axis=-1).reshape(Bt * S, H)   # (Bt*S, H) f32

    # Single (Bt*S, H) x (H, H) output projection (contraction K = H).
    attn = jnp.dot(bf16(o), w_o_ref[...],
                   preferred_element_type=jnp.float32) + b_o_ref[...]
    h = layernorm(h + attn, g1_ref[...], be1_ref[...])        # post-LN

    # ---- feed-forward (ReLU), dim_feedforward = 4H ---------------------------
    ff = jnp.dot(bf16(h), w1_ref[...],
                 preferred_element_type=jnp.float32) + b1_ref[...]
    ff = jnp.maximum(ff, 0.0)
    ff = jnp.dot(bf16(ff), w2_ref[...],
                 preferred_element_type=jnp.float32) + b2_ref[...]
    h = layernorm(h + ff, g2_ref[...], be2_ref[...])          # post-LN
    h_ref[...] = h

    # ---- last layer: mean over seq + classifier (lane-dense padded output) ---
    @pl.when(layer == num_layers - 1)
    def _():
        pooled = jnp.sum(h.reshape(Bt, S, H), axis=1) * (1.0 / S)   # (Bt, H)
        logits = jnp.dot(bf16(pooled), w_cls_ref[...],
                         preferred_element_type=jnp.float32) + b_cls_ref[...]
        out_ref[...] = logits.astype(out_ref.dtype)


# ----------------------------------------------------------------------------
# Wrapper: single pallas_call, grid = (batch blocks, layers)
# ----------------------------------------------------------------------------

def transformer_forward(params, x, *, num_heads, num_layers, num_classes,
                        block_b=8):
    B, S, I = x.shape
    H = params["b_in"].shape[-1]
    head_dim = H // num_heads
    F = 4 * H
    c_pad = params["b_cls"].shape[-1]         # classifier padded to 128 lanes
    bt = min(B, block_b)                      # batch elements per grid step
    assert B % bt == 0

    pos = params["pos"][:S, :]                # (S, H), added per batch in-kernel

    kernel = functools.partial(_transformer_kernel, num_heads=num_heads,
                               head_dim=head_dim)

    def resident_spec(a):
        # Same block for every grid step -> stays VMEM-resident.
        return pl.BlockSpec(a.shape, lambda b, l, _nd=a.ndim: (0,) * _nd)

    def layer_spec(a):
        # Leading (layer) axis squeezed; block index follows the layer grid id,
        # so only one layer's tensor is resident (double-buffered by Pallas).
        # TODO(synk): on v6e/v5e (128 MiB VMEM) pipeline_mode=pl.Buffered(3)
        # would deepen the weight prefetch.
        return pl.BlockSpec((None,) + a.shape[1:],
                            lambda b, l, _nd=a.ndim: (l,) + (0,) * (_nd - 1))

    layer_weights = (params["w_qkv"], params["b_qkv"], params["w_o"],
                     params["b_o"], params["w1"], params["b1"],
                     params["w2"], params["b2"], params["g1"], params["be1"],
                     params["g2"], params["be2"])
    shared_head = (pos, params["w_in"], params["b_in"])
    shared_tail = (params["w_cls"], params["b_cls"])

    in_specs = ([pl.BlockSpec((bt, S, I), lambda b, l: (b, 0, 0))]
                + [resident_spec(a) for a in shared_head]
                + [layer_spec(a) for a in layer_weights]
                + [resident_spec(a) for a in shared_tail])

    # Advisory cost estimate for the XLA scheduler.
    flops = B * (2 * S * I * H
                 + num_layers * (2 * S * H * 3 * H          # fused QKV
                                 + 4 * num_heads * S * S * head_dim  # scores+AV
                                 + 2 * S * H * H            # out projection
                                 + 4 * S * H * F)           # FFN
                 + 2 * H * c_pad)
    transcendentals = B * num_layers * num_heads * S * S
    all_args = (x, *shared_head, *layer_weights, *shared_tail)
    bytes_accessed = (sum(int(a.size) * a.dtype.itemsize for a in all_args)
                      + B * c_pad * 4)

    out = pl.pallas_call(
        kernel,
        out_shape=jax.ShapeDtypeStruct((B, c_pad), jnp.float32),
        grid=(B // bt, num_layers),
        in_specs=in_specs,
        out_specs=pl.BlockSpec((bt, c_pad), lambda b, l: (b, 0)),
        scratch_shapes=[pltpu.VMEM((bt * S, H), jnp.float32)],
        compiler_params=pltpu.CompilerParams(
            dimension_semantics=("parallel", "arbitrary"),
            vmem_limit_bytes=48 * 1024 * 1024),   # fits v7x's 64 MiB physical
        cost_estimate=pl.CostEstimate(flops=int(flops),
                                      transcendentals=int(transcendentals),
                                      bytes_accessed=int(bytes_accessed)),
    )(x, *shared_head, *layer_weights, *shared_tail)
    return out[:, :num_classes]


# ----------------------------------------------------------------------------
# Parameters (deterministic, synthetic — not a checkpoint load)
# ----------------------------------------------------------------------------

def init_params(key, input_size, hidden, num_layers, num_heads, num_classes,
                max_len=1000):
    H, F, L = hidden, 4 * hidden, num_layers
    head_dim = H // num_heads
    c_pad = ((num_classes + 127) // 128) * 128      # lane-dense classifier N
    keys = jax.random.split(key, 17)

    def u(k, shape, fan_in):
        lim = 1.0 / math.sqrt(fan_in)
        return jax.random.uniform(k, shape, jnp.float32, -lim, lim)

    p = {}
    p["w_in"] = u(keys[0], (input_size, H), input_size).astype(jnp.bfloat16)
    p["b_in"] = u(keys[1], (1, H), input_size)
    p["pos"] = jax.random.normal(keys[2], (max_len, H), jnp.float32)

    # Fused QKV projection (L, H, 3H); the 1/sqrt(head_dim) softmax scale is
    # folded into the q-third of the weight and bias (free, host-side).
    scale = 1.0 / math.sqrt(head_dim)
    wq = u(keys[3], (L, H, H), H) * scale
    wk = u(keys[4], (L, H, H), H)
    wv = u(keys[5], (L, H, H), H)
    p["w_qkv"] = jnp.concatenate([wq, wk, wv], axis=-1).astype(jnp.bfloat16)
    bq = u(keys[6], (L, 1, H), H) * scale
    bk = u(keys[7], (L, 1, H), H)
    bv = u(keys[8], (L, 1, H), H)
    p["b_qkv"] = jnp.concatenate([bq, bk, bv], axis=-1)

    p["w_o"] = u(keys[9], (L, H, H), H).astype(jnp.bfloat16)
    p["b_o"] = u(keys[10], (L, 1, H), H)
    p["w1"] = u(keys[11], (L, H, F), H).astype(jnp.bfloat16)
    p["b1"] = u(keys[12], (L, 1, F), H)
    p["w2"] = u(keys[13], (L, F, H), F).astype(jnp.bfloat16)
    p["b2"] = u(keys[14], (L, 1, H), F)
    p["g1"] = jnp.ones((L, 1, H), jnp.float32)
    p["be1"] = jnp.zeros((L, 1, H), jnp.float32)
    p["g2"] = jnp.ones((L, 1, H), jnp.float32)
    p["be2"] = jnp.zeros((L, 1, H), jnp.float32)

    # Classifier padded to 128 output lanes (sliced back outside the kernel).
    w_cls = u(keys[15], (H, num_classes), H)
    b_cls = u(keys[16], (1, num_classes), H)
    p["w_cls"] = (jnp.zeros((H, c_pad), jnp.float32)
                  .at[:, :num_classes].set(w_cls).astype(jnp.bfloat16))
    p["b_cls"] = jnp.zeros((1, c_pad), jnp.float32).at[:, :num_classes].set(b_cls)
    return p


# ----------------------------------------------------------------------------
# Main
# ----------------------------------------------------------------------------

if __name__ == "__main__":
    BATCH, SEQ, INPUT, HIDDEN = 2, 8, 16, 32
    NUM_LAYERS, NUM_HEADS, NUM_CLASSES = 2, 4, 5

    root = jax.random.PRNGKey(0)
    pkey, xkey = jax.random.split(root)
    params = init_params(pkey, INPUT, HIDDEN, NUM_LAYERS, NUM_HEADS, NUM_CLASSES)
    x = jax.random.normal(xkey, (BATCH, SEQ, INPUT), jnp.float32)

    fwd = jax.jit(functools.partial(transformer_forward,
                                    num_heads=NUM_HEADS,
                                    num_layers=NUM_LAYERS,
                                    num_classes=NUM_CLASSES))
    out = jax.block_until_ready(fwd(params, x))

    # TODO(synk): nn.Dropout layers are identity in eval mode; stochastic
    # training-time dropout is not implemented.
    assert out.shape == (BATCH, NUM_CLASSES)
    assert bool(jnp.all(jnp.isfinite(out)))
    print("KERNEL_OK")
</pallas_src>

<mosaic_0001>
module attributes {stable_mosaic.version = 11 : i64} {
  func.func @_transformer_kernel(%arg0: i32, %arg1: i32, %arg2: memref<2x8x16xf32, #tpu.memory_space<vmem>>, %arg3: memref<8x32xf32, #tpu.memory_space<vmem>>, %arg4: memref<16x32xbf16, #tpu.memory_space<vmem>>, %arg5: memref<1x32xf32, #tpu.memory_space<vmem>>, %arg6: memref<1x32x96xbf16, #tpu.memory_space<vmem>>, %arg7: memref<1x1x96xf32, #tpu.memory_space<vmem>>, %arg8: memref<1x32x32xbf16, #tpu.memory_space<vmem>>, %arg9: memref<1x1x32xf32, #tpu.memory_space<vmem>>, %arg10: memref<1x32x128xbf16, #tpu.memory_space<vmem>>, %arg11: memref<1x1x128xf32, #tpu.memory_space<vmem>>, %arg12: memref<1x128x32xbf16, #tpu.memory_space<vmem>>, %arg13: memref<1x1x32xf32, #tpu.memory_space<vmem>>, %arg14: memref<1x1x32xf32, #tpu.memory_space<vmem>>, %arg15: memref<1x1x32xf32, #tpu.memory_space<vmem>>, %arg16: memref<1x1x32xf32, #tpu.memory_space<vmem>>, %arg17: memref<1x1x32xf32, #tpu.memory_space<vmem>>, %arg18: memref<32x128xbf16, #tpu.memory_space<vmem>>, %arg19: memref<1x128xf32, #tpu.memory_space<vmem>>, %arg20: memref<2x128xf32, #tpu.memory_space<vmem>>, %arg21: memref<16x32xf32, #tpu.memory_space<vmem>>) attributes {dimension_semantics = [#tpu.dimension_semantics<parallel>, #tpu.dimension_semantics<arbitrary>], iteration_bounds = array<i64: 1, 2>, scalar_prefetch = 0 : i64, scratch_operands = 1 : i64, tpu.core_type = #tpu.core_type<tc>, window_params = [{transform_indices = @transform_0, window_bounds = array<i64: 2, 8, 16>}, {pipeline_mode = #tpu.pipeline_mode<synchronous>, transform_indices = @transform_1, window_bounds = array<i64: 8, 32>}, {pipeline_mode = #tpu.pipeline_mode<synchronous>, transform_indices = @transform_2, window_bounds = array<i64: 16, 32>}, {pipeline_mode = #tpu.pipeline_mode<synchronous>, transform_indices = @transform_3, window_bounds = array<i64: 1, 32>}, {transform_indices = @transform_4, window_bounds = array<i64: 1, 32, 96>}, {transform_indices = @transform_5, window_bounds = array<i64: 1, 1, 96>}, {transform_indices = @transform_6, window_bounds = array<i64: 1, 32, 32>}, {transform_indices = @transform_7, window_bounds = array<i64: 1, 1, 32>}, {transform_indices = @transform_8, window_bounds = array<i64: 1, 32, 128>}, {transform_indices = @transform_9, window_bounds = array<i64: 1, 1, 128>}, {transform_indices = @transform_10, window_bounds = array<i64: 1, 128, 32>}, {transform_indices = @transform_11, window_bounds = array<i64: 1, 1, 32>}, {transform_indices = @transform_12, window_bounds = array<i64: 1, 1, 32>}, {transform_indices = @transform_13, window_bounds = array<i64: 1, 1, 32>}, {transform_indices = @transform_14, window_bounds = array<i64: 1, 1, 32>}, {transform_indices = @transform_15, window_bounds = array<i64: 1, 1, 32>}, {pipeline_mode = #tpu.pipeline_mode<synchronous>, transform_indices = @transform_16, window_bounds = array<i64: 32, 128>}, {pipeline_mode = #tpu.pipeline_mode<synchronous>, transform_indices = @transform_17, window_bounds = array<i64: 1, 128>}, {transform_indices = @transform_18, window_bounds = array<i64: 2, 128>}]} {
    %c0_i32 = arith.constant 0 : i32
    %0 = arith.cmpi eq, %arg1, %c0_i32 : i32
    %1 = arith.extui %0 : i1 to i32
    %c0_i32_0 = arith.constant 0 : i32
    %2 = arith.cmpi ne, %1, %c0_i32_0 : i32
    scf.if %2 {
      %c0_71 = arith.constant 0 : index
      %c0_72 = arith.constant 0 : index
      %c0_73 = arith.constant 0 : index
      %171 = vector.load %arg2[%c0_71, %c0_72, %c0_73] : memref<2x8x16xf32, #tpu.memory_space<vmem>>, vector<2x8x16xf32>
      %172 = vector.shape_cast %171 : vector<2x8x16xf32> to vector<16x16xf32>
      %173 = arith.truncf %172 : vector<16x16xf32> to vector<16x16xbf16>
      %c0_74 = arith.constant 0 : index
      %c0_75 = arith.constant 0 : index
      %174 = vector.load %arg4[%c0_74, %c0_75] : memref<16x32xbf16, #tpu.memory_space<vmem>>, vector<16x32xbf16>
      %cst_76 = arith.constant dense<0.000000e+00> : vector<16x32xf32>
      %175 = tpu.matmul %173, %174, %cst_76 {dimension_numbers = #tpu.dot_dimension_numbers<[1], [0], [0], [1], [0, 0, 1, 1], [], []>} : vector<16x16xbf16>, vector<16x32xbf16>, vector<16x32xf32> -> vector<16x32xf32>
      %c0_77 = arith.constant 0 : index
      %c0_78 = arith.constant 0 : index
      %176 = vector.load %arg5[%c0_77, %c0_78] : memref<1x32xf32, #tpu.memory_space<vmem>>, vector<1x32xf32>
      %177 = vector.broadcast %176 : vector<1x32xf32> to vector<16x32xf32>
      %178 = arith.addf %175, %177 : vector<16x32xf32>
      %179 = vector.shape_cast %178 : vector<16x32xf32> to vector<2x8x32xf32>
      %c0_79 = arith.constant 0 : index
      %c0_80 = arith.constant 0 : index
      %180 = vector.load %arg3[%c0_79, %c0_80] : memref<8x32xf32, #tpu.memory_space<vmem>>, vector<8x32xf32>
      %181 = vector.shape_cast %180 : vector<8x32xf32> to vector<1x8x32xf32>
      %182 = vector.broadcast %181 : vector<1x8x32xf32> to vector<2x8x32xf32>
      %183 = arith.addf %179, %182 : vector<2x8x32xf32>
      %184 = vector.shape_cast %183 : vector<2x8x32xf32> to vector<16x32xf32>
      %c0_81 = arith.constant 0 : index
      %c0_82 = arith.constant 0 : index
      %185 = vector.load %arg21[%c0_81, %c0_82] : memref<16x32xf32, #tpu.memory_space<vmem>>, vector<16x32xf32>
      tpu.vector_store %arg21[%c0_81, %c0_82], %184 {strides = array<i32>} : memref<16x32xf32, #tpu.memory_space<vmem>>, vector<16x32xf32>,
    } else {
    }
    %c0 = arith.constant 0 : index
    %c0_1 = arith.constant 0 : index
    %3 = vector.load %arg21[%c0, %c0_1] : memref<16x32xf32, #tpu.memory_space<vmem>>, vector<16x32xf32>
    %4 = arith.truncf %3 : vector<16x32xf32> to vector<16x32xbf16>
    %c0_2 = arith.constant 0 : index
    %c0_3 = arith.constant 0 : index
    %c0_4 = arith.constant 0 : index
    %5 = vector.load %arg6[%c0_2, %c0_3, %c0_4] : memref<1x32x96xbf16, #tpu.memory_space<vmem>>, vector<1x32x96xbf16>
    %6 = vector.shape_cast %5 : vector<1x32x96xbf16> to vector<32x96xbf16>
    %cst = arith.constant dense<0.000000e+00> : vector<16x96xf32>
    %7 = tpu.matmul %4, %6, %cst {dimension_numbers = #tpu.dot_dimension_numbers<[1], [0], [0], [1], [0, 0, 1, 1], [], []>} : vector<16x32xbf16>, vector<32x96xbf16>, vector<16x96xf32> -> vector<16x96xf32>
    %c0_5 = arith.constant 0 : index
    %c0_6 = arith.constant 0 : index
    %c0_7 = arith.constant 0 : index
    %8 = vector.load %arg7[%c0_5, %c0_6, %c0_7] : memref<1x1x96xf32, #tpu.memory_space<vmem>>, vector<1x1x96xf32>
    %9 = vector.shape_cast %8 : vector<1x1x96xf32> to vector<1x96xf32>
    %10 = vector.broadcast %9 : vector<1x96xf32> to vector<16x96xf32>
    %11 = arith.addf %7, %10 : vector<16x96xf32>
    %12 = vector.extract_strided_slice %11 {offsets = [0, 0], sizes = [16, 32], strides = [1, 1]} : vector<16x96xf32> to vector<16x32xf32>
    %13 = arith.truncf %12 : vector<16x32xf32> to vector<16x32xbf16>
    %14 = vector.shape_cast %13 : vector<16x32xbf16> to vector<2x8x32xbf16>
    %15 = vector.extract_strided_slice %11 {offsets = [0, 32], sizes = [16, 32], strides = [1, 1]} : vector<16x96xf32> to vector<16x32xf32>
    %16 = arith.truncf %15 : vector<16x32xf32> to vector<16x32xbf16>
    %17 = vector.shape_cast %16 : vector<16x32xbf16> to vector<2x8x32xbf16>
    %18 = vector.extract_strided_slice %11 {offsets = [0, 64], sizes = [16, 32], strides = [1, 1]} : vector<16x96xf32> to vector<16x32xf32>
    %19 = arith.truncf %18 : vector<16x32xf32> to vector<16x32xbf16>
    %20 = vector.shape_cast %19 : vector<16x32xbf16> to vector<2x8x32xbf16>
    %21 = vector.extract_strided_slice %14 {offsets = [0, 0, 0], sizes = [2, 8, 8], strides = [1, 1, 1]} : vector<2x8x32xbf16> to vector<2x8x8xbf16>
    %22 = vector.extract_strided_slice %17 {offsets = [0, 0, 0], sizes = [2, 8, 8], strides = [1, 1, 1]} : vector<2x8x32xbf16> to vector<2x8x8xbf16>
    "tpu.trace_start"() <{level = 10 : i32, message = "bqd,bkd->bqk"}> : () -> ()
    %cst_8 = arith.constant dense<0.000000e+00> : vector<2x8x8xf32>
    %23 = tpu.matmul %21, %22, %cst_8 {dimension_numbers = #tpu.dot_dimension_numbers<[2], [2], [1], [1], [0, 0, 0, 1, 1, 1], [0], [0]>} : vector<2x8x8xbf16>, vector<2x8x8xbf16>, vector<2x8x8xf32> -> vector<2x8x8xf32>
    "tpu.trace_stop"() : () -> ()
    %cst_9 = arith.constant dense<0xFF800000> : vector<2x8xf32>
    %24 = vector.multi_reduction <maximumf>, %23, %cst_9 [2] : vector<2x8x8xf32> to vector<2x8xf32>
    %25 = vector.shape_cast %24 : vector<2x8xf32> to vector<2x8x1xf32>
    %26 = vector.broadcast %25 : vector<2x8x1xf32> to vector<2x8x8xf32>
    %27 = arith.subf %23, %26 : vector<2x8x8xf32>
    %28 = math.exp %27 : vector<2x8x8xf32>
    %cst_10 = arith.constant dense<0.000000e+00> : vector<2x8xf32>
    %29 = vector.multi_reduction <add>, %28, %cst_10 [2] : vector<2x8x8xf32> to vector<2x8xf32>
    %30 = vector.shape_cast %29 : vector<2x8xf32> to vector<2x8x1xf32>
    %31 = tpu.reciprocal %30 {approx = true} : vector<2x8x1xf32> -> vector<2x8x1xf32>
    %32 = vector.broadcast %31 : vector<2x8x1xf32> to vector<2x8x8xf32>
    %33 = arith.mulf %28, %32 : vector<2x8x8xf32>
    %34 = arith.truncf %33 : vector<2x8x8xf32> to vector<2x8x8xbf16>
    %35 = vector.extract_strided_slice %20 {offsets = [0, 0, 0], sizes = [2, 8, 8], strides = [1, 1, 1]} : vector<2x8x32xbf16> to vector<2x8x8xbf16>
    "tpu.trace_start"() <{level = 10 : i32, message = "bqk,bkd->bqd"}> : () -> ()
    %cst_11 = arith.constant dense<0.000000e+00> : vector<2x8x8xf32>
    %36 = tpu.matmul %34, %35, %cst_11 {dimension_numbers = #tpu.dot_dimension_numbers<[2], [1], [1], [2], [0, 0, 0, 1, 1, 2], [0], [0]>} : vector<2x8x8xbf16>, vector<2x8x8xbf16>, vector<2x8x8xf32> -> vector<2x8x8xf32>
    "tpu.trace_stop"() : () -> ()
    %37 = vector.extract_strided_slice %14 {offsets = [0, 0, 8], sizes = [2, 8, 8], strides = [1, 1, 1]} : vector<2x8x32xbf16> to vector<2x8x8xbf16>
    %38 = vector.extract_strided_slice %17 {offsets = [0, 0, 8], sizes = [2, 8, 8], strides = [1, 1, 1]} : vector<2x8x32xbf16> to vector<2x8x8xbf16>
    "tpu.trace_start"() <{level = 10 : i32, message = "bqd,bkd->bqk"}> : () -> ()
    %cst_12 = arith.constant dense<0.000000e+00> : vector<2x8x8xf32>
    %39 = tpu.matmul %37, %38, %cst_12 {dimension_numbers = #tpu.dot_dimension_numbers<[2], [2], [1], [1], [0, 0, 0, 1, 1, 1], [0], [0]>} : vector<2x8x8xbf16>, vector<2x8x8xbf16>, vector<2x8x8xf32> -> vector<2x8x8xf32>
    "tpu.trace_stop"() : () -> ()
    %cst_13 = arith.constant dense<0xFF800000> : vector<2x8xf32>
    %40 = vector.multi_reduction <maximumf>, %39, %cst_13 [2] : vector<2x8x8xf32> to vector<2x8xf32>
    %41 = vector.shape_cast %40 : vector<2x8xf32> to vector<2x8x1xf32>
    %42 = vector.broadcast %41 : vector<2x8x1xf32> to vector<2x8x8xf32>
    %43 = arith.subf %39, %42 : vector<2x8x8xf32>
    %44 = math.exp %43 : vector<2x8x8xf32>
    %cst_14 = arith.constant dense<0.000000e+00> : vector<2x8xf32>
    %45 = vector.multi_reduction <add>, %44, %cst_14 [2] : vector<2x8x8xf32> to vector<2x8xf32>
    %46 = vector.shape_cast %45 : vector<2x8xf32> to vector<2x8x1xf32>
    %47 = tpu.reciprocal %46 {approx = true} : vector<2x8x1xf32> -> vector<2x8x1xf32>
    %48 = vector.broadcast %47 : vector<2x8x1xf32> to vector<2x8x8xf32>
    %49 = arith.mulf %44, %48 : vector<2x8x8xf32>
    %50 = arith.truncf %49 : vector<2x8x8xf32> to vector<2x8x8xbf16>
    %51 = vector.extract_strided_slice %20 {offsets = [0, 0, 8], sizes = [2, 8, 8], strides = [1, 1, 1]} : vector<2x8x32xbf16> to vector<2x8x8xbf16>
    "tpu.trace_start"() <{level = 10 : i32, message = "bqk,bkd->bqd"}> : () -> ()
    %cst_15 = arith.constant dense<0.000000e+00> : vector<2x8x8xf32>
    %52 = tpu.matmul %50, %51, %cst_15 {dimension_numbers = #tpu.dot_dimension_numbers<[2], [1], [1], [2], [0, 0, 0, 1, 1, 2], [0], [0]>} : vector<2x8x8xbf16>, vector<2x8x8xbf16>, vector<2x8x8xf32> -> vector<2x8x8xf32>
    "tpu.trace_stop"() : () -> ()
    %53 = vector.extract_strided_slice %14 {offsets = [0, 0, 16], sizes = [2, 8, 8], strides = [1, 1, 1]} : vector<2x8x32xbf16> to vector<2x8x8xbf16>
    %54 = vector.extract_strided_slice %17 {offsets = [0, 0, 16], sizes = [2, 8, 8], strides = [1, 1, 1]} : vector<2x8x32xbf16> to vector<2x8x8xbf16>
    "tpu.trace_start"() <{level = 10 : i32, message = "bqd,bkd->bqk"}> : () -> ()
    %cst_16 = arith.constant dense<0.000000e+00> : vector<2x8x8xf32>
    %55 = tpu.matmul %53, %54, %cst_16 {dimension_numbers = #tpu.dot_dimension_numbers<[2], [2], [1], [1], [0, 0, 0, 1, 1, 1], [0], [0]>} : vector<2x8x8xbf16>, vector<2x8x8xbf16>, vector<2x8x8xf32> -> vector<2x8x8xf32>
    "tpu.trace_stop"() : () -> ()
    %cst_17 = arith.constant dense<0xFF800000> : vector<2x8xf32>
    %56 = vector.multi_reduction <maximumf>, %55, %cst_17 [2] : vector<2x8x8xf32> to vector<2x8xf32>
    %57 = vector.shape_cast %56 : vector<2x8xf32> to vector<2x8x1xf32>
    %58 = vector.broadcast %57 : vector<2x8x1xf32> to vector<2x8x8xf32>
    %59 = arith.subf %55, %58 : vector<2x8x8xf32>
    %60 = math.exp %59 : vector<2x8x8xf32>
    %cst_18 = arith.constant dense<0.000000e+00> : vector<2x8xf32>
    %61 = vector.multi_reduction <add>, %60, %cst_18 [2] : vector<2x8x8xf32> to vector<2x8xf32>
    %62 = vector.shape_cast %61 : vector<2x8xf32> to vector<2x8x1xf32>
    %63 = tpu.reciprocal %62 {approx = true} : vector<2x8x1xf32> -> vector<2x8x1xf32>
    %64 = vector.broadcast %63 : vector<2x8x1xf32> to vector<2x8x8xf32>
    %65 = arith.mulf %60, %64 : vector<2x8x8xf32>
    %66 = arith.truncf %65 : vector<2x8x8xf32> to vector<2x8x8xbf16>
    %67 = vector.extract_strided_slice %20 {offsets = [0, 0, 16], sizes = [2, 8, 8], strides = [1, 1, 1]} : vector<2x8x32xbf16> to vector<2x8x8xbf16>
    "tpu.trace_start"() <{level = 10 : i32, message = "bqk,bkd->bqd"}> : () -> ()
    %cst_19 = arith.constant dense<0.000000e+00> : vector<2x8x8xf32>
    %68 = tpu.matmul %66, %67, %cst_19 {dimension_numbers = #tpu.dot_dimension_numbers<[2], [1], [1], [2], [0, 0, 0, 1, 1, 2], [0], [0]>} : vector<2x8x8xbf16>, vector<2x8x8xbf16>, vector<2x8x8xf32> -> vector<2x8x8xf32>
    "tpu.trace_stop"() : () -> ()
    %69 = vector.extract_strided_slice %14 {offsets = [0, 0, 24], sizes = [2, 8, 8], strides = [1, 1, 1]} : vector<2x8x32xbf16> to vector<2x8x8xbf16>
    %70 = vector.extract_strided_slice %17 {offsets = [0, 0, 24], sizes = [2, 8, 8], strides = [1, 1, 1]} : vector<2x8x32xbf16> to vector<2x8x8xbf16>
    "tpu.trace_start"() <{level = 10 : i32, message = "bqd,bkd->bqk"}> : () -> ()
    %cst_20 = arith.constant dense<0.000000e+00> : vector<2x8x8xf32>
    %71 = tpu.matmul %69, %70, %cst_20 {dimension_numbers = #tpu.dot_dimension_numbers<[2], [2], [1], [1], [0, 0, 0, 1, 1, 1], [0], [0]>} : vector<2x8x8xbf16>, vector<2x8x8xbf16>, vector<2x8x8xf32> -> vector<2x8x8xf32>
    "tpu.trace_stop"() : () -> ()
    %cst_21 = arith.constant dense<0xFF800000> : vector<2x8xf32>
    %72 = vector.multi_reduction <maximumf>, %71, %cst_21 [2] : vector<2x8x8xf32> to vector<2x8xf32>
    %73 = vector.shape_cast %72 : vector<2x8xf32> to vector<2x8x1xf32>
    %74 = vector.broadcast %73 : vector<2x8x1xf32> to vector<2x8x8xf32>
    %75 = arith.subf %71, %74 : vector<2x8x8xf32>
    %76 = math.exp %75 : vector<2x8x8xf32>
    %cst_22 = arith.constant dense<0.000000e+00> : vector<2x8xf32>
    %77 = vector.multi_reduction <add>, %76, %cst_22 [2] : vector<2x8x8xf32> to vector<2x8xf32>
    %78 = vector.shape_cast %77 : vector<2x8xf32> to vector<2x8x1xf32>
    %79 = tpu.reciprocal %78 {approx = true} : vector<2x8x1xf32> -> vector<2x8x1xf32>
    %80 = vector.broadcast %79 : vector<2x8x1xf32> to vector<2x8x8xf32>
    %81 = arith.mulf %76, %80 : vector<2x8x8xf32>
    %82 = arith.truncf %81 : vector<2x8x8xf32> to vector<2x8x8xbf16>
    %83 = vector.extract_strided_slice %20 {offsets = [0, 0, 24], sizes = [2, 8, 8], strides = [1, 1, 1]} : vector<2x8x32xbf16> to vector<2x8x8xbf16>
    "tpu.trace_start"() <{level = 10 : i32, message = "bqk,bkd->bqd"}> : () -> ()
    %cst_23 = arith.constant dense<0.000000e+00> : vector<2x8x8xf32>
    %84 = tpu.matmul %82, %83, %cst_23 {dimension_numbers = #tpu.dot_dimension_numbers<[2], [1], [1], [2], [0, 0, 0, 1, 1, 2], [0], [0]>} : vector<2x8x8xbf16>, vector<2x8x8xbf16>, vector<2x8x8xf32> -> vector<2x8x8xf32>
    "tpu.trace_stop"() : () -> ()
    %85 = tpu.concatenate %36, %52, %68, %84 in 2 : vector<2x8x8xf32>, vector<2x8x8xf32>, vector<2x8x8xf32>, vector<2x8x8xf32> -> vector<2x8x32xf32>
    %86 = vector.shape_cast %85 : vector<2x8x32xf32> to vector<16x32xf32>
    %87 = arith.truncf %86 : vector<16x32xf32> to vector<16x32xbf16>
    %c0_24 = arith.constant 0 : index
    %c0_25 = arith.constant 0 : index
    %c0_26 = arith.constant 0 : index
    %88 = vector.load %arg8[%c0_24, %c0_25, %c0_26] : memref<1x32x32xbf16, #tpu.memory_space<vmem>>, vector<1x32x32xbf16>
    %89 = vector.shape_cast %88 : vector<1x32x32xbf16> to vector<32x32xbf16>
    %cst_27 = arith.constant dense<0.000000e+00> : vector<16x32xf32>
    %90 = tpu.matmul %87, %89, %cst_27 {dimension_numbers = #tpu.dot_dimension_numbers<[1], [0], [0], [1], [0, 0, 1, 1], [], []>} : vector<16x32xbf16>, vector<32x32xbf16>, vector<16x32xf32> -> vector<16x32xf32>
    %c0_28 = arith.constant 0 : index
    %c0_29 = arith.constant 0 : index
    %c0_30 = arith.constant 0 : index
    %91 = vector.load %arg9[%c0_28, %c0_29, %c0_30] : memref<1x1x32xf32, #tpu.memory_space<vmem>>, vector<1x1x32xf32>
    %92 = vector.shape_cast %91 : vector<1x1x32xf32> to vector<1x32xf32>
    %93 = vector.broadcast %92 : vector<1x32xf32> to vector<16x32xf32>
    %94 = arith.addf %90, %93 : vector<16x32xf32>
    %95 = arith.addf %3, %94 : vector<16x32xf32>
    %c0_31 = arith.constant 0 : index
    %c0_32 = arith.constant 0 : index
    %c0_33 = arith.constant 0 : index
    %96 = vector.load %arg14[%c0_31, %c0_32, %c0_33] : memref<1x1x32xf32, #tpu.memory_space<vmem>>, vector<1x1x32xf32>
    %97 = vector.shape_cast %96 : vector<1x1x32xf32> to vector<1x32xf32>
    %c0_34 = arith.constant 0 : index
    %c0_35 = arith.constant 0 : index
    %c0_36 = arith.constant 0 : index
    %98 = vector.load %arg15[%c0_34, %c0_35, %c0_36] : memref<1x1x32xf32, #tpu.memory_space<vmem>>, vector<1x1x32xf32>
    %99 = vector.shape_cast %98 : vector<1x1x32xf32> to vector<1x32xf32>
    %cst_37 = arith.constant dense<0.000000e+00> : vector<16xf32>
    %100 = vector.multi_reduction <add>, %95, %cst_37 [1] : vector<16x32xf32> to vector<16xf32>
    %101 = vector.shape_cast %100 : vector<16xf32> to vector<16x1xf32>
    %cst_38 = arith.constant 3.200000e+01 : f32
    %102 = vector.broadcast %cst_38 : f32 to vector<16x1xf32>
    %103 = arith.divf %101, %102 : vector<16x1xf32>
    %104 = vector.broadcast %103 : vector<16x1xf32> to vector<16x32xf32>
    %105 = arith.subf %95, %104 : vector<16x32xf32>
    %106 = arith.mulf %105, %105 : vector<16x32xf32>
    %cst_39 = arith.constant dense<0.000000e+00> : vector<16xf32>
    %107 = vector.multi_reduction <add>, %106, %cst_39 [1] : vector<16x32xf32> to vector<16xf32>
    %108 = vector.shape_cast %107 : vector<16xf32> to vector<16x1xf32>
    %cst_40 = arith.constant 3.200000e+01 : f32
    %109 = vector.broadcast %cst_40 : f32 to vector<16x1xf32>
    %110 = arith.divf %108, %109 : vector<16x1xf32>
    %111 = vector.broadcast %103 : vector<16x1xf32> to vector<16x32xf32>
    %112 = arith.subf %95, %111 : vector<16x32xf32>
    %cst_41 = arith.constant 9.99999974E-6 : f32
    %113 = vector.broadcast %cst_41 : f32 to vector<16x1xf32>
    %114 = arith.addf %110, %113 : vector<16x1xf32>
    %115 = math.rsqrt %114 : vector<16x1xf32>
    %116 = vector.broadcast %115 : vector<16x1xf32> to vector<16x32xf32>
    %117 = arith.mulf %112, %116 : vector<16x32xf32>
    %118 = vector.broadcast %97 : vector<1x32xf32> to vector<16x32xf32>
    %119 = arith.mulf %117, %118 : vector<16x32xf32>
    %120 = vector.broadcast %99 : vector<1x32xf32> to vector<16x32xf32>
    %121 = arith.addf %119, %120 : vector<16x32xf32>
    %122 = arith.truncf %121 : vector<16x32xf32> to vector<16x32xbf16>
    %c0_42 = arith.constant 0 : index
    %c0_43 = arith.constant 0 : index
    %c0_44 = arith.constant 0 : index
    %123 = vector.load %arg10[%c0_42, %c0_43, %c0_44] : memref<1x32x128xbf16, #tpu.memory_space<vmem>>, vector<1x32x128xbf16>
    %124 = vector.shape_cast %123 : vector<1x32x128xbf16> to vector<32x128xbf16>
    %cst_45 = arith.constant dense<0.000000e+00> : vector<16x128xf32>
    %125 = tpu.matmul %122, %124, %cst_45 {dimension_numbers = #tpu.dot_dimension_numbers<[1], [0], [0], [1], [0, 0, 1, 1], [], []>} : vector<16x32xbf16>, vector<32x128xbf16>, vector<16x128xf32> -> vector<16x128xf32>
    %c0_46 = arith.constant 0 : index
    %c0_47 = arith.constant 0 : index
    %c0_48 = arith.constant 0 : index
    %126 = vector.load %arg11[%c0_46, %c0_47, %c0_48] : memref<1x1x128xf32, #tpu.memory_space<vmem>>, vector<1x1x128xf32>
    %127 = vector.shape_cast %126 : vector<1x1x128xf32> to vector<1x128xf32>
    %128 = vector.broadcast %127 : vector<1x128xf32> to vector<16x128xf32>
    %129 = arith.addf %125, %128 : vector<16x128xf32>
    %cst_49 = arith.constant 0.000000e+00 : f32
    %130 = vector.broadcast %cst_49 : f32 to vector<16x128xf32>
    %131 = arith.maximumf %129, %130 : vector<16x128xf32>
    %132 = arith.truncf %131 : vector<16x128xf32> to vector<16x128xbf16>
    %c0_50 = arith.constant 0 : index
    %c0_51 = arith.constant 0 : index
    %c0_52 = arith.constant 0 : index
    %133 = vector.load %arg12[%c0_50, %c0_51, %c0_52] : memref<1x128x32xbf16, #tpu.memory_space<vmem>>, vector<1x128x32xbf16>
    %134 = vector.shape_cast %133 : vector<1x128x32xbf16> to vector<128x32xbf16>
    %cst_53 = arith.constant dense<0.000000e+00> : vector<16x32xf32>
    %135 = tpu.matmul %132, %134, %cst_53 {dimension_numbers = #tpu.dot_dimension_numbers<[1], [0], [0], [1], [0, 0, 1, 1], [], []>} : vector<16x128xbf16>, vector<128x32xbf16>, vector<16x32xf32> -> vector<16x32xf32>
    %c0_54 = arith.constant 0 : index
    %c0_55 = arith.constant 0 : index
    %c0_56 = arith.constant 0 : index
    %136 = vector.load %arg13[%c0_54, %c0_55, %c0_56] : memref<1x1x32xf32, #tpu.memory_space<vmem>>, vector<1x1x32xf32>
    %137 = vector.shape_cast %136 : vector<1x1x32xf32> to vector<1x32xf32>
    %138 = vector.broadcast %137 : vector<1x32xf32> to vector<16x32xf32>
    %139 = arith.addf %135, %138 : vector<16x32xf32>
    %140 = arith.addf %121, %139 : vector<16x32xf32>
    %c0_57 = arith.constant 0 : index
    %c0_58 = arith.constant 0 : index
    %c0_59 = arith.constant 0 : index
    %141 = vector.load %arg16[%c0_57, %c0_58, %c0_59] : memref<1x1x32xf32, #tpu.memory_space<vmem>>, vector<1x1x32xf32>
    %142 = vector.shape_cast %141 : vector<1x1x32xf32> to vector<1x32xf32>
    %c0_60 = arith.constant 0 : index
    %c0_61 = arith.constant 0 : index
    %c0_62 = arith.constant 0 : index
    %143 = vector.load %arg17[%c0_60, %c0_61, %c0_62] : memref<1x1x32xf32, #tpu.memory_space<vmem>>, vector<1x1x32xf32>
    %144 = vector.shape_cast %143 : vector<1x1x32xf32> to vector<1x32xf32>
    %cst_63 = arith.constant dense<0.000000e+00> : vector<16xf32>
    %145 = vector.multi_reduction <add>, %140, %cst_63 [1] : vector<16x32xf32> to vector<16xf32>
    %146 = vector.shape_cast %145 : vector<16xf32> to vector<16x1xf32>
    %cst_64 = arith.constant 3.200000e+01 : f32
    %147 = vector.broadcast %cst_64 : f32 to vector<16x1xf32>
    %148 = arith.divf %146, %147 : vector<16x1xf32>
    %149 = vector.broadcast %148 : vector<16x1xf32> to vector<16x32xf32>
    %150 = arith.subf %140, %149 : vector<16x32xf32>
    %151 = arith.mulf %150, %150 : vector<16x32xf32>
    %cst_65 = arith.constant dense<0.000000e+00> : vector<16xf32>
    %152 = vector.multi_reduction <add>, %151, %cst_65 [1] : vector<16x32xf32> to vector<16xf32>
    %153 = vector.shape_cast %152 : vector<16xf32> to vector<16x1xf32>
    %cst_66 = arith.constant 3.200000e+01 : f32
    %154 = vector.broadcast %cst_66 : f32 to vector<16x1xf32>
    %155 = arith.divf %153, %154 : vector<16x1xf32>
    %156 = vector.broadcast %148 : vector<16x1xf32> to vector<16x32xf32>
    %157 = arith.subf %140, %156 : vector<16x32xf32>
    %cst_67 = arith.constant 9.99999974E-6 : f32
    %158 = vector.broadcast %cst_67 : f32 to vector<16x1xf32>
    %159 = arith.addf %155, %158 : vector<16x1xf32>
    %160 = math.rsqrt %159 : vector<16x1xf32>
    %161 = vector.broadcast %160 : vector<16x1xf32> to vector<16x32xf32>
    %162 = arith.mulf %157, %161 : vector<16x32xf32>
    %163 = vector.broadcast %142 : vector<1x32xf32> to vector<16x32xf32>
    %164 = arith.mulf %162, %163 : vector<16x32xf32>
    %165 = vector.broadcast %144 : vector<1x32xf32> to vector<16x32xf32>
    %166 = arith.addf %164, %165 : vector<16x32xf32>
    %c0_68 = arith.constant 0 : index
    %c0_69 = arith.constant 0 : index
    %167 = vector.load %arg21[%c0_68, %c0_69] : memref<16x32xf32, #tpu.memory_space<vmem>>, vector<16x32xf32>
    tpu.vector_store %arg21[%c0_68, %c0_69], %166 {strides = array<i32>} : memref<16x32xf32, #tpu.memory_space<vmem>>, vector<16x32xf32>,
    %c1_i32 = arith.constant 1 : i32
    %168 = arith.cmpi eq, %arg1, %c1_i32 : i32
    %169 = arith.extui %168 : i1 to i32
    %c0_i32_70 = arith.constant 0 : i32
    %170 = arith.cmpi ne, %169, %c0_i32_70 : i32
    scf.if %170 {
      %171 = vector.shape_cast %166 : vector<16x32xf32> to vector<2x8x32xf32>
      %cst_71 = arith.constant dense<0.000000e+00> : vector<2x32xf32>
      %172 = vector.multi_reduction <add>, %171, %cst_71 [1] : vector<2x8x32xf32> to vector<2x32xf32>
      %cst_72 = arith.constant 1.250000e-01 : f32
      %173 = vector.broadcast %cst_72 : f32 to vector<2x32xf32>
      %174 = arith.mulf %172, %173 : vector<2x32xf32>
      %175 = arith.truncf %174 : vector<2x32xf32> to vector<2x32xbf16>
      %c0_73 = arith.constant 0 : index
      %c0_74 = arith.constant 0 : index
      %176 = vector.load %arg18[%c0_73, %c0_74] : memref<32x128xbf16, #tpu.memory_space<vmem>>, vector<32x128xbf16>
      %cst_75 = arith.constant dense<0.000000e+00> : vector<2x128xf32>
      %177 = tpu.matmul %175, %176, %cst_75 {dimension_numbers = #tpu.dot_dimension_numbers<[1], [0], [0], [1], [0, 0, 1, 1], [], []>} : vector<2x32xbf16>, vector<32x128xbf16>, vector<2x128xf32> -> vector<2x128xf32>
      %c0_76 = arith.constant 0 : index
      %c0_77 = arith.constant 0 : index
      %178 = vector.load %arg19[%c0_76, %c0_77] : memref<1x128xf32, #tpu.memory_space<vmem>>, vector<1x128xf32>
      %179 = vector.broadcast %178 : vector<1x128xf32> to vector<2x128xf32>
      %180 = arith.addf %177, %179 : vector<2x128xf32>
      %c0_78 = arith.constant 0 : index
      %c0_79 = arith.constant 0 : index
      %181 = vector.load %arg20[%c0_78, %c0_79] : memref<2x128xf32, #tpu.memory_space<vmem>>, vector<2x128xf32>
      tpu.vector_store %arg20[%c0_78, %c0_79], %180 {strides = array<i32>} : memref<2x128xf32, #tpu.memory_space<vmem>>, vector<2x128xf32>,
    } else {
    }
    return
  }
  func.func @transform_0(%arg0: i32, %arg1: i32) -> (i32, i32, i32) {
    %c0_i32 = arith.constant 0 : i32
    %c0_i32_0 = arith.constant 0 : i32
    %c0_i32_1 = arith.constant 0 : i32
    return %arg0, %c0_i32, %c0_i32_0 : i32, i32, i32
  }
  func.func @transform_1(%arg0: i32, %arg1: i32) -> (i32, i32) {
    %c0_i32 = arith.constant 0 : i32
    %c0_i32_0 = arith.constant 0 : i32
    %c0_i32_1 = arith.constant 0 : i32
    return %c0_i32, %c0_i32_0 : i32, i32
  }
  func.func @transform_2(%arg0: i32, %arg1: i32) -> (i32, i32) {
    %c0_i32 = arith.constant 0 : i32
    %c0_i32_0 = arith.constant 0 : i32
    %c0_i32_1 = arith.constant 0 : i32
    return %c0_i32, %c0_i32_0 : i32, i32
  }
  func.func @transform_3(%arg0: i32, %arg1: i32) -> (i32, i32) {
    %c0_i32 = arith.constant 0 : i32
    %c0_i32_0 = arith.constant 0 : i32
    %c0_i32_1 = arith.constant 0 : i32
    return %c0_i32, %c0_i32_0 : i32, i32
  }
  func.func @transform_4(%arg0: i32, %arg1: i32) -> (i32, i32, i32) {
    %c0_i32 = arith.constant 0 : i32
    %c0_i32_0 = arith.constant 0 : i32
    %c0_i32_1 = arith.constant 0 : i32
    return %arg1, %c0_i32, %c0_i32_0 : i32, i32, i32
  }
  func.func @transform_5(%arg0: i32, %arg1: i32) -> (i32, i32, i32) {
    %c0_i32 = arith.constant 0 : i32
    %c0_i32_0 = arith.constant 0 : i32
    %c0_i32_1 = arith.constant 0 : i32
    return %arg1, %c0_i32, %c0_i32_0 : i32, i32, i32
  }
  func.func @transform_6(%arg0: i32, %arg1: i32) -> (i32, i32, i32) {
    %c0_i32 = arith.constant 0 : i32
    %c0_i32_0 = arith.constant 0 : i32
    %c0_i32_1 = arith.constant 0 : i32
    return %arg1, %c0_i32, %c0_i32_0 : i32, i32, i32
  }
  func.func @transform_7(%arg0: i32, %arg1: i32) -> (i32, i32, i32) {
    %c0_i32 = arith.constant 0 : i32
    %c0_i32_0 = arith.constant 0 : i32
    %c0_i32_1 = arith.constant 0 : i32
    return %arg1, %c0_i32, %c0_i32_0 : i32, i32, i32
  }
  func.func @transform_8(%arg0: i32, %arg1: i32) -> (i32, i32, i32) {
    %c0_i32 = arith.constant 0 : i32
    %c0_i32_0 = arith.constant 0 : i32
    %c0_i32_1 = arith.constant 0 : i32
    return %arg1, %c0_i32, %c0_i32_0 : i32, i32, i32
  }
  func.func @transform_9(%arg0: i32, %arg1: i32) -> (i32, i32, i32) {
    %c0_i32 = arith.constant 0 : i32
    %c0_i32_0 = arith.constant 0 : i32
    %c0_i32_1 = arith.constant 0 : i32
    return %arg1, %c0_i32, %c0_i32_0 : i32, i32, i32
  }
  func.func @transform_10(%arg0: i32, %arg1: i32) -> (i32, i32, i32) {
    %c0_i32 = arith.constant 0 : i32
    %c0_i32_0 = arith.constant 0 : i32
    %c0_i32_1 = arith.constant 0 : i32
    return %arg1, %c0_i32, %c0_i32_0 : i32, i32, i32
  }
  func.func @transform_11(%arg0: i32, %arg1: i32) -> (i32, i32, i32) {
    %c0_i32 = arith.constant 0 : i32
    %c0_i32_0 = arith.constant 0 : i32
    %c0_i32_1 = arith.constant 0 : i32
    return %arg1, %c0_i32, %c0_i32_0 : i32, i32, i32
  }
  func.func @transform_12(%arg0: i32, %arg1: i32) -> (i32, i32, i32) {
    %c0_i32 = arith.constant 0 : i32
    %c0_i32_0 = arith.constant 0 : i32
    %c0_i32_1 = arith.constant 0 : i32
    return %arg1, %c0_i32, %c0_i32_0 : i32, i32, i32
  }
  func.func @transform_13(%arg0: i32, %arg1: i32) -> (i32, i32, i32) {
    %c0_i32 = arith.constant 0 : i32
    %c0_i32_0 = arith.constant 0 : i32
    %c0_i32_1 = arith.constant 0 : i32
    return %arg1, %c0_i32, %c0_i32_0 : i32, i32, i32
  }
  func.func @transform_14(%arg0: i32, %arg1: i32) -> (i32, i32, i32) {
    %c0_i32 = arith.constant 0 : i32
    %c0_i32_0 = arith.constant 0 : i32
    %c0_i32_1 = arith.constant 0 : i32
    return %arg1, %c0_i32, %c0_i32_0 : i32, i32, i32
  }
  func.func @transform_15(%arg0: i32, %arg1: i32) -> (i32, i32, i32) {
    %c0_i32 = arith.constant 0 : i32
    %c0_i32_0 = arith.constant 0 : i32
    %c0_i32_1 = arith.constant 0 : i32
    return %arg1, %c0_i32, %c0_i32_0 : i32, i32, i32
  }
  func.func @transform_16(%arg0: i32, %arg1: i32) -> (i32, i32) {
    %c0_i32 = arith.constant 0 : i32
    %c0_i32_0 = arith.constant 0 : i32
    %c0_i32_1 = arith.constant 0 : i32
    return %c0_i32, %c0_i32_0 : i32, i32
  }
  func.func @transform_17(%arg0: i32, %arg1: i32) -> (i32, i32) {
    %c0_i32 = arith.constant 0 : i32
    %c0_i32_0 = arith.constant 0 : i32
    %c0_i32_1 = arith.constant 0 : i32
    return %c0_i32, %c0_i32_0 : i32, i32
  }
  func.func @transform_18(%arg0: i32, %arg1: i32) -> (i32, i32) {
    %c0_i32 = arith.constant 0 : i32
    %c0_i32_0 = arith.constant 0 : i32
    return %arg0, %c0_i32 : i32, i32
  }
}

</mosaic_0001>

<bundles_post_ra>
// kernel: transformer_forward.1
= control target key start
LH: loop header
LB: loop body
LE: loop exit
PB: predicated region body
PF: predicated region fallthrough
CT: control target
= control target key end

     0   :  { %s3418_s0 = inlined_call_operand.vmem [shape: f32[2,8,16], index: 0, kind: input, shape index: {}]   ;;  %s3419_s1 = inlined_call_operand.vmem [shape: f32[8,32], index: 1, kind: input, shape index: {}]   ;;  %s3420_s2 = inlined_call_operand.vmem [shape: bf16[16,32], index: 2, kind: input, shape index: {}]   ;;  %s3421_s3 = inlined_call_operand.vmem [shape: f32[1,32], index: 3, kind: input, shape index: {}]   ;;  %s3422_s4 = inlined_call_operand.vmem [shape: bf16[2,32,96], index: 4, kind: input, shape index: {}]   ;;  %s3423_s5 = inlined_call_operand.vmem [shape: f32[2,1,96], index: 5, kind: input, shape index: {}]   ;;  %s3424_s6 = inlined_call_operand.vmem [shape: bf16[2,32,32], index: 6, kind: input, shape index: {}]   ;;  %s3425_s7 = inlined_call_operand.vmem [shape: f32[2,1,32], index: 7, kind: input, shape index: {}]   ;;  %s3426_s8 = inlined_call_operand.vmem [shape: bf16[2,32,128], index: 8, kind: input, shape index: {}]   ;;  %s3427_s9 = inlined_call_operand.vmem [shape: f32[2,1,128], index: 9, kind: input, shape index: {}]   ;;  %s3428_s10 = inlined_call_operand.vmem [shape: bf16[2,128,32], index: 10, kind: input, shape index: {}]   ;;  %s3429_s11 = inlined_call_operand.vmem [shape: f32[2,1,32], index: 11, kind: input, shape index: {}]   ;;  %s3430_s12 = inlined_call_operand.vmem [shape: f32[2,1,32], index: 12, kind: input, shape index: {}]   ;;  %s3431_s13 = inlined_call_operand.vmem [shape: f32[2,1,32], index: 13, kind: input, shape index: {}]   ;;  %s3432_s14 = inlined_call_operand.vmem [shape: f32[2,1,32], index: 14, kind: input, shape index: {}]   ;;  %s3433_s15 = inlined_call_operand.vmem [shape: f32[2,1,32], index: 15, kind: input, shape index: {}]   ;;  %s3434_s16 = inlined_call_operand.vmem [shape: bf16[32,128], index: 16, kind: input, shape index: {}]   ;;  %s3435_s17 = inlined_call_operand.vmem [shape: f32[1,128], index: 17, kind: input, shape index: {}]   ;;  %s3436_s18 = inlined_call_operand.hbm [shape: f32[2,128], index: 18, kind: output, shape index: {}]  }
   0x1   :  { %3442 = sst [smem:[#allocation9_spill]] %s3418_s0 }
   0x2   :  { %3443 = sst [smem:[#allocation10_spill]] %s3419_s1 }
   0x3   :  { %3444 = sst [smem:[#allocation11_spill]] %s3420_s2 }
   0x4   :  { %3445 = sst [smem:[#allocation12_spill]] %s3422_s4 }
   0x5   :  { %3446 = sst [smem:[#allocation13_spill]] %s3424_s6 }
   0x6   :  { %3447 = sst [smem:[#allocation14_spill]] %s3426_s8 }
   0x7   :  { %3448 = sst [smem:[#allocation15_spill]] %s3427_s9 }
   0x8   :  { %3449 = sst [smem:[#allocation16_spill]] %s3434_s16 }
   0x9   :  { %3450 = sst [smem:[#allocation17_spill]] %s3435_s17 }
   0xa   :  { %3451 = sst [smem:[#allocation18_spill]] %s3436_s18 }
   0xb   :  { %23 = vsyncpa [#allocation4], 0  ;;  %s3035_s27 = smov 0   ;;  %s3037_s28 = smov 0  }
   0xc   :  { %s3039_s29 = smov 0  }
   0xd LB: > { %3452 = sst [smem:[#allocation6_spill]] %s2913_s28  ;;  %s38_s0 = sadd.s32 1, %s2913_s28  ;;  %s2917_s29 = sphi %s3039_s29, %s29_s29   ;;  %s2913_s28 = sphi %s3037_s28, %s3476_s28   ;;  %s2909_s27 = sphi %s3035_s27, %s3475_s27  }
   0xe   : > { %3453 = sst [smem:[#allocation7_spill]] %s2917_s29  ;;  %p39_p0 = scmp.ge.s32.totalorder %s38_s0, 2 }
   0xf   : > { %p2462_p1 = scmp.ge.s32.totalorder %s2917_s29, 1  ;;  %p630_p2 = scmp.lt.s32.totalorder %s2917_s29, 3 }
  0x10   : > { %s3478_s0 = smov (%p39_p0, %s38_s0), 0 }
  0x11   : > { %3454 = sst [smem:[#allocation8_spill]] %s3478_s0  ;;  %p631_p3 = pnand %p2462_p1, %p630_p2 }
  0x12   : > { %p729_p4 = scmp.lt.s32.totalorder (!%p631_p3), %s2909_s27, 1  ;;  %s3455_s4 = sld [smem:[#allocation12_spill]] (!%p631_p3) }
  0x13   : > { %634 = sbr.rel (%p631_p3) target bundleno = 4644 (0x1224), region = 92  ;;  %s3456_s6 = sld [smem:[#allocation13_spill]] (!%p631_p3) }
  0x14   : > { %s3457_s8 = sld [smem:[#allocation14_spill]] (!%p631_p3)  ;;  %p2471_p5 = scmp.ne.s32.totalorder (!%p631_p3), %s2909_s27, 0 }
  0x1a   : > { %s3058_s19 = scalar_select %p729_p4, %s2909_s27, 1 }
  0x1b   : > { %777 = sbr.rel (%p2471_p5) target bundleno = 262 (0x106), region = 96  ;;  %s3459_s26 = sld [smem:[#allocation11_spill]] (!%p2471_p5)  ;;  %v2919_v1 = vmov (!%p2471_p5), 0.0   ;;  %vm2920_vm0 = vmmov (!%p2471_p5), 0   ;;  %vm796_vm1 = vcmask (!%p2471_p5), 130048   ;;  %vm844_vm2 = vcmask (!%p2471_p5), 261120  }
  0x1c   : > { %s2527_s1 = sshll.u32 %s3058_s19, 4  ;;  %s2530_s23 = sshll.u32 %s3058_s19, 6  ;;  %2588 = vmatprep.subr.bf16.mxu0 (!%p2471_p5), %v2919_v1  ;;  %2590 = vmatprep.mubr.msk.bf16.mxu0 (!%p2471_p5), %vm2920_vm0, %v2919_v1  ;;  %v2472_v5 = vld [vmem:[%s3421_s3] ss:$0 sm:$0xff] (!%p2471_p5) }
  0x1d   : > { %s3068_s24 = scalar_lea.vmem %s3455_s4, %s2527_s1  ;;  %s3073_s30 = scalar_lea.vmem %s3456_s6, %s2527_s1 }
  0x1e   : > { %s3082_s16 = scalar_lea.vmem %s3457_s8, %s2527_s1  ;;  %s3092_s25 = scalar_lea.vmem %s3428_s10, %s2530_s23 }
  0x1f   : > { %s763_s17 = scalar_lea.vmem %s3430_s12, %s3058_s19  ;;  %s766_s8 = scalar_lea.vmem %s3431_s13, %s3058_s19 }
  0x20   : > { %s769_s2 = scalar_lea.vmem %s3432_s14, %s3058_s19  ;;  %s772_s22 = scalar_lea.vmem %s3433_s15, %s3058_s19 }
  0x21   : > { %v2793_v0 = vld [vmem:[%s3459_s26] sm:$0xff] (!%p2471_p5)   ;;  %s3460_s29 = sld [smem:[#allocation9_spill]] (!%p2471_p5)  ;;  %s3462_s23 = sld [smem:[#allocation10_spill]] (!%p2471_p5) }
  0x22   : > { %2589 = vmatpush3.bf16.msra.mxu0 %v2793_v0 }
  0x27   : > { %s3461_s1 = smov %s3460_s29  ;;  %v778_v2 = vld [vmem:[%s3460_s29] sm:$0xff] }
  0x28   : > { %v779_v3 = vld [vmem:[%s3461_s1 + $0x8] sm:$0xff]  ;;  %v841_v7 = vld [vmem:[%s3462_s23] sm:$0xff] }
  0x29   : > { %v780_v4 = vpack.c.bf16 %v779_v3, %v778_v2 }
  0x2b   : > { %2591 = vmatmul.mubr.msk.bf16.vlgmr.msra.gmra.mrb[0].mxu0 %vm796_vm1, %v780_v4 }
  0xfe   : > { %v834_v6 = vpop.f32.mrb[0].mxu0 }
  0xff   : > { %v835_v8 = vadd.f32 %v2472_v5, %v834_v6  ;;  %v2592_v9 = vpop.f32.mrb[1].mxu0 }
 0x100   : > { %v837_v10 = vpop.f32.mrb[2].mxu0 }
 0x101   : > { %v842_v11 = vadd.f32 %v841_v7, %v835_v8  ;;  %v838_v12 = vadd.f32 %v2472_v5, %v837_v10  ;;  %v2593_v13 = vpop.f32.mrb[3].mxu0 }
 0x103   : > { %845 = vst.msk [vmem:[#allocation2] sm:$0xff] %vm844_vm2, %v842_v11  ;;  %v843_v14 = vadd.f32 %v841_v7, %v838_v12 }
 0x105   : > { %846 = vst.msk [vmem:[#allocation2 + $0x8] sm:$0xff] %vm844_vm2, %v843_v14 }
 0x106 PF: > { %v2809_v15 = vld [vmem:[%s3068_s24] sm:$0xff]   ;;  %v2921_v16 = vmov 0.0   ;;  %v2810_v17 = vld [vmem:[%s3068_s24 + $0x8] sm:$0xff]   ;;  %vm2922_vm3 = vmmov 0   ;;  %vm873_vm4 = vcmask 261120   ;;  %s3463_s26 = scalar_lea.vmem %s3423_s5, %s3058_s19  ;;  %s2923_s18 = smov 96  }
 0x107   : > { %2594 = vmatprep.subr.bf16.mxu0 %v2921_v16  ;;  %2614 = vmatprep.subr.bf16.mxu1 %v2921_v16  ;;  %v2475_v21 = vld [vmem:[%s3463_s26] ss:$0 sm:$0xff]  ;;  %vm926_vm5 = vcmask 64512   ;;  %s2924_s0 = smov 64   ;;  %s2925_s29 = smov 88   ;;  %vm1050_vm6 = vcmask 1043456  }
 0x108   : > { %2595 = vmatpush3.bf16.msra.mxu0 %v2809_v15  ;;  %2598 = vmatprep.mubr.msk.bf16.mxu0 %vm2922_vm3, %v2921_v16  ;;  %s2926_s20 = smov 120   ;;  %s2927_s9 = smov 56   ;;  %vm1828_vm7 = vcmask 130048   ;;  %vm1831_vm8 = vcmask 195584  }
 0x109   : > { %2596 = vmatprep.subr.bf16.mxu0 %v2921_v16  ;;  %2616 = vmatprep.mubr.msk.bf16.mxu1 %vm2922_vm3, %v2921_v16  ;;  %s2928_s21 = smov 80   ;;  %s2929_s4 = smov 112  }
 0x10a   : > { %v3136_v18 = vld [vmem:[#allocation2] sm:$0xff]  ;;  %s2930_s6 = smov 48   ;;  %s2931_s23 = smov 72  }
 0x10b   : > { %s2932_s24 = smov 104   ;;  %s2933_s28 = smov 40  }
 0x10c   : > { %v3138_v19 = vld [vmem:[#allocation2 + $0x8] sm:$0xff]  ;;  %2597 = vmatpush3.bf16.msra.mxu0 %v2810_v17  ;;  %s2934_s26 = smov 8   ;;  %p2518_p6 = scmp.ne.s32.totalorder %s2909_s27, 1 }
 0x10d   : > { %v849_v20 = vpack.c.bf16 %v3138_v19, %v3136_v18  ;;  %2602 = vmatprep.subr.bf16.mxu0 %v2921_v16  ;;  %vm2938_vm9 = vmmov (!%p2518_p6), 0   ;;  %vm2217_vm10 = vcmask (!%p2518_p6), 1041409  }
 0x10f   : > { %2599 = vmatmul.mubr.msk.bf16.vlgmr.msra.gmra.mrb[0].mxu0 %vm873_vm4, %v849_v20 }
 0x110   : > { %2604 = vmatprep.mubr.msk.bf16.mxu0 %vm2922_vm3, %v2921_v16 }
 0x1e2   : > { %v911_v22 = vpop.f32.mrb[0].mxu0 }
 0x1e3   : > { %v912_v23 = vadd.f32 %v2475_v21, %v911_v22  ;;  %v2600_v24 = vpop.f32.mrb[1].mxu0 }
 0x1e4   : > { %v914_v25 = vpop.f32.mrb[2].mxu0 }
 0x1e5   : > { %v3154_v26 = vpack.c.bf16 %v912_v23, %v912_v23  ;;  %v915_v27 = vadd.f32 %v2475_v21, %v914_v25  ;;  %v2601_v28 = vpop.f32.mrb[3].mxu0 }
 0x1e7   : > { %924 = vrot.lane.b32.xlu0 %v3154_v26, %s2923_s18  ;;  %v3157_v29 = vpack.c.bf16 %v915_v27, %v915_v27 }
 0x1eb   : > { %973 = vrot.lane.b32.xlu0 %v3157_v29, %s2923_s18  ;;  %s2935_s18 = smov 16  }
 0x259   : > { %v925_v30 = vpop.permute.xlu0 %924 }
 0x25a   : > { %v931_v31 = vsel %vm926_vm5, %v925_v30, 0 }
 0x25b   : > { %2603 = vmatpush3.bf16.xpose.msra.mxu0 %v931_v31 }
 0x25c   : > { %2608 = vmatprep.subr.bf16.mxu0 %v2921_v16 }
 0x25d   : > { %v974_v32 = vpop.permute.xlu0 %973 }
 0x25e   : > { %v979_v33 = vsel %vm926_vm5, %v974_v32, 0 }
 0x262   : > { %2605 = vmatmul.mubr.msk.bf16.vlgmr.msra.gmra.mrb[4].mxu0 %vm926_vm5, %v3154_v26 }
 0x263   : > { %2609 = vmatpush3.bf16.xpose.msra.mxu0 %v979_v33  ;;  %2610 = vmatprep.mubr.msk.bf16.mxu0 %vm2922_vm3, %v2921_v16 }
 0x264   : > { %2620 = vmatprep.subr.bf16.mxu0 %v2921_v16 }
 0x26a   : > { %2611 = vmatmul.mubr.msk.bf16.vlgmr.msra.gmra.mrb[8].mxu0 %vm926_vm5, %v3157_v29 }
 0x26b   : > { %2622 = vmatprep.mubr.msk.bf16.mxu0 %vm2922_vm3, %v2921_v16 }
 0x335   : > { %v967_v34 = vpop.f32.mrb[4].mxu0 }
 0x336   : > { %v2606_v35 = vpop.f32.mrb[5].mxu0  ;;  %v1021_v36 = vsel %vm926_vm5, %v967_v34, -inf }
 0x337   : > { %1022 = vmax.xlane.f32.xlu1 %v1021_v36  ;;  %v970_v37 = vpop.f32.mrb[6].mxu0 }
 0x338   : > { %v2607_v38 = vpop.f32.mrb[7].mxu0 }
 0x33d   : > { %v1015_v39 = vpop.f32.mrb[8].mxu0 }
 0x33e   : > { %v2612_v40 = vpop.f32.mrb[9].mxu0  ;;  %v1024_v41 = vsel %vm926_vm5, %v1015_v39, -inf }
 0x33f   : > { %1025 = vmax.xlane.f32.xlu1 %v1024_v41  ;;  %v1018_v42 = vpop.f32.mrb[10].mxu0 }
 0x340   : > { %v2613_v43 = vpop.f32.mrb[11].mxu0 }
 0x350   : > { %1045 = vrot.lane.b32.xlu1 %v3154_v26, %s2924_s0 }
 0x354   : > { %1094 = vrot.lane.b32.xlu1 %v3157_v29, %s2924_s0  ;;  %s2936_s0 = smov 24  }
 0x358   : > { %1144 = vrot.lane.b32.xlu1 %v3154_v26, %s2925_s29 }
 0x3c4   : > { %v1023_v44 = vpop.xlane.xlu1 %1022 }
 0x3c5   : > { %v1027_v45 = vsub.f32 %v967_v34, %v1023_v44 }
 0x3c7   : > { %v1029_v46 = vmul.f32 1.442695, %v1027_v45 }
 0x3c9   : > { %2823 = vpow2.f32 %v1029_v46 }
 0x3cc   : > { %v1026_v47 = vpop.xlane.xlu1 %1025 }
 0x3cd   : > { %v1028_v48 = vsub.f32 %v1015_v39, %v1026_v47 }
 0x3cf   : > { %v1031_v49 = vmul.f32 1.442695, %v1028_v48 }
 0x3d0   : > { %v1046_v50 = vpop.permute.xlu1 %1045 }
 0x3d1   : > { %2825 = vpow2.f32 %v1031_v49  ;;  %v1052_v51 = vsel %vm1050_vm6, %v1046_v50, 0 }
 0x3d2   : > { %2615 = vmatpush3.bf16.msra.mxu1 %v1052_v51 }
 0x3d3   : > { %v2824_v52 = vpop.eup %2823  ;;  %2626 = vmatprep.subr.bf16.mxu1 %v2921_v16 }
 0x3d4   : > { %v1095_v53 = vpop.permute.xlu1 %1094  ;;  %v1033_v54 = vsel %vm926_vm5, %v2824_v52, 0.0 }
 0x3d5   : > { %v1100_v55 = vsel %vm1050_vm6, %v1095_v53, 0  ;;  %1034 = vadd.xlane.f32.xlu0 %v1033_v54 }
 0x3d6   : > { %2621 = vmatpush3.bf16.msra.mxu0 %v1100_v55 }
 0x3d7   : > { %2632 = vmatprep.subr.bf16.mxu0 %v2921_v16 }
 0x3d8   : > { %v1145_v59 = vpop.permute.xlu1 %1144 }
 0x3d9   : > { %v1150_v0 = vsel %vm926_vm5, %v1145_v59, 0 }
 0x3db   : > { %v2826_v56 = vpop.eup %2825 }
 0x3dc   : > { %v1036_v57 = vsel %vm926_vm5, %v2826_v56, 0.0 }
 0x3dd   : > { %1037 = vadd.xlane.f32.xlu1 %v1036_v57 }
 0x3eb   : > { %1142 = vrot.lane.b32.xlu0 %v3154_v26, %s2926_s20 }
 0x3ee   : > { %1194 = vrot.lane.b32.xlu1 %v3157_v29, %s2925_s29 }
 0x3f2   : > { %1192 = vrot.lane.b32.xlu1 %v3157_v29, %s2926_s20  ;;  %s3464_s20 = scalar_lea.vmem %s3425_s7, %s3058_s19 }
 0x462   : > { %v1035_v58 = vpop.xlane.xlu0 %1034 }
 0x463   : > { %2827 = vrcp.f32 %v1035_v58 }
 0x466   : > { %v1143_v5 = vpop.permute.xlu0 %1142 }
 0x46a   : > { %v1038_v60 = vpop.xlane.xlu1 %1037 }
 0x46b   : > { %2829 = vrcp.f32 %v1038_v60 }
 0x46d   : > { %v2828_v61 = vpop.eup %2827 }
 0x46e   : > { %v1041_v62 = vmul.f32 %v2828_v61, %v2824_v52  ;;  %v1195_v3 = vpop.permute.xlu1 %1194 }
 0x46f   : > { %v1200_v6 = vsel %vm926_vm5, %v1195_v3, 0 }
 0x470   : > { %v1043_v63 = vpack.c.bf16 %v1041_v62, %v1041_v62 }
 0x472   : > { %2617 = vmatmul.mubr.msk.bf16.vlgmr.msra.gmra.mrb[0].mxu1 %vm926_vm5, %v1043_v63  ;;  %v1193_v7 = vpop.permute.xlu1 %1192 }
 0x473   : > { %2627 = vmatpush3.bf16.xpose.msra.mxu1 %v1150_v0  ;;  %2628 = vmatprep.mubr.msk.bf16.mxu1 %vm2922_vm3, %v2921_v16 }
 0x474   : > { %2638 = vmatprep.subr.bf16.mxu1 %v2921_v16 }
 0x475   : > { %v2830_v1 = vpop.eup %2829 }
 0x476   : > { %v1042_v2 = vmul.f32 %v2830_v1, %v2826_v56 }
 0x478   : > { %v1044_v4 = vpack.c.bf16 %v1042_v2, %v1042_v2 }
 0x47a   : > { %2623 = vmatmul.mubr.msk.bf16.vlgmr.msra.gmra.mrb[12].mxu0 %vm926_vm5, %v1044_v4  ;;  %2629 = vmatmul.mubr.msk.bf16.vlgmr.msra.gmra.mrb[4].mxu1 %vm926_vm5, %v1143_v5 }
 0x47b   : > { %2633 = vmatpush3.bf16.xpose.msra.mxu0 %v1200_v6  ;;  %2634 = vmatprep.mubr.msk.bf16.mxu0 %vm2922_vm3, %v2921_v16 }
 0x47c   : > { %2644 = vmatprep.subr.bf16.mxu0 %v2921_v16  ;;  %2640 = vmatprep.mubr.msk.bf16.mxu1 %vm2922_vm3, %v2921_v16 }
 0x482   : > { %2635 = vmatmul.mubr.msk.bf16.vlgmr.msra.gmra.mrb[16].mxu0 %vm926_vm5, %v1193_v7 }
 0x483   : > { %2646 = vmatprep.mubr.msk.bf16.mxu0 %vm2922_vm3, %v2921_v16 }
 0x545   : > { %v3202_v8 = vpop.f32.mrb[0].mxu1 }
 0x546   : > { %v2618_v9 = vpop.f32.mrb[1].mxu1 }
 0x547   : > { %v1091_v10 = vpop.f32.mrb[2].mxu1 }
 0x548   : > { %v2619_v11 = vpop.f32.mrb[3].mxu1 }
 0x54d   : > { %v3204_v12 = vpop.f32.mrb[12].mxu0  ;;  %v1186_v13 = vpop.f32.mrb[4].mxu1 }
 0x54e   : > { %v2624_v14 = vpop.f32.mrb[13].mxu0  ;;  %v2630_v15 = vpop.f32.mrb[5].mxu1  ;;  %v1242_v17 = vsel %vm926_vm5, %v1186_v13, -inf }
 0x54f   : > { %1243 = vmax.xlane.f32.xlu1 %v1242_v17  ;;  %v1139_v20 = vpop.f32.mrb[14].mxu0  ;;  %v1189_v21 = vpop.f32.mrb[6].mxu1 }
 0x550   : > { %v2625_v22 = vpop.f32.mrb[15].mxu0  ;;  %v2631_v23 = vpop.f32.mrb[7].mxu1 }
 0x555   : > { %v1236_v24 = vpop.f32.mrb[16].mxu0 }
 0x556   : > { %v2636_v25 = vpop.f32.mrb[17].mxu0  ;;  %v1245_v27 = vsel %vm926_vm5, %v1236_v24, -inf }
 0x557   : > { %1246 = vmax.xlane.f32.xlu0 %v1245_v27  ;;  %v1239_v28 = vpop.f32.mrb[18].mxu0 }
 0x558   : > { %v2637_v30 = vpop.f32.mrb[19].mxu0 }
 0x560   : > { %1266 = vrot.lane.b32.xlu1 %v3154_v26, %s2927_s9 }
 0x564   : > { %1364 = vrot.lane.b32.xlu1 %v3154_v26, %s2928_s21 }
 0x56d   : > { %1314 = vrot.lane.b32.xlu0 %v3157_v29, %s2927_s9  ;;  %s3469_s9 = sld [smem:[#allocation17_spill]] (!%p2518_p6) }
 0x571   : > { %1362 = vrot.lane.b32.xlu0 %v3154_v26, %s2929_s4 }
 0x5dc   : > { %v1244_v31 = vpop.xlane.xlu1 %1243 }
 0x5dd   : > { %v1248_v32 = vsub.f32 %v1186_v13, %v1244_v31 }
 0x5df   : > { %v1250_v33 = vmul.f32 1.442695, %v1248_v32 }
 0x5e0   : > { %v1267_v34 = vpop.permute.xlu1 %1266 }
 0x5e1   : > { %2831 = vpow2.f32 %v1250_v33  ;;  %v1272_v35 = vsel %vm1050_vm6, %v1267_v34, 0 }
 0x5e2   : > { %2639 = vmatpush3.bf16.msra.mxu1 %v1272_v35 }
 0x5e3   : > { %2650 = vmatprep.subr.bf16.mxu1 %v2921_v16 }
 0x5e4   : > { %v1247_v36 = vpop.xlane.xlu0 %1246  ;;  %v1365_v45 = vpop.permute.xlu1 %1364 }
 0x5e5   : > { %v1249_v37 = vsub.f32 %v1236_v24, %v1247_v36  ;;  %v1370_v51 = vsel %vm926_vm5, %v1365_v45, 0 }
 0x5e7   : > { %v1252_v38 = vmul.f32 1.442695, %v1249_v37 }
 0x5e8   : > { %v1315_v39 = vpop.permute.xlu0 %1314 }
 0x5e9   : > { %2833 = vpow2.f32 %v1252_v38  ;;  %v1320_v40 = vsel %vm1050_vm6, %v1315_v39, 0 }
 0x5ea   : > { %2645 = vmatpush3.bf16.msra.mxu0 %v1320_v40 }
 0x5eb   : > { %v2832_v41 = vpop.eup %2831  ;;  %2656 = vmatprep.subr.bf16.mxu0 %v2921_v16 }
 0x5ec   : > { %v1254_v42 = vsel %vm926_vm5, %v2832_v41, 0.0  ;;  %v1363_v56 = vpop.permute.xlu0 %1362 }
 0x5ed   : > { %1255 = vadd.xlane.f32.xlu1 %v1254_v42 }
 0x5f3   : > { %v2834_v43 = vpop.eup %2833 }
 0x5f4   : > { %v1257_v44 = vsel %vm926_vm5, %v2834_v43, 0.0 }
 0x5f5   : > { %1258 = vadd.xlane.f32.xlu1 %v1257_v44 }
 0x606   : > { %1414 = vrot.lane.b32.xlu1 %v3157_v29, %s2928_s21 }
 0x60a   : > { %1412 = vrot.lane.b32.xlu1 %v3157_v29, %s2929_s4 }
 0x67a   : > { %v1256_v46 = vpop.xlane.xlu1 %1255 }
 0x67b   : > { %2835 = vrcp.f32 %v1256_v46 }
 0x682   : > { %v1259_v47 = vpop.xlane.xlu1 %1258 }
 0x683   : > { %2837 = vrcp.f32 %v1259_v47 }
 0x685   : > { %v2836_v48 = vpop.eup %2835 }
 0x686   : > { %v1262_v49 = vmul.f32 %v2836_v48, %v2832_v41  ;;  %v1415_v54 = vpop.permute.xlu1 %1414 }
 0x687   : > { %v1420_v57 = vsel %vm926_vm5, %v1415_v54, 0 }
 0x688   : > { %v1264_v50 = vpack.c.bf16 %v1262_v49, %v1262_v49 }
 0x68a   : > { %2641 = vmatmul.mubr.msk.bf16.vlgmr.msra.gmra.mrb[8].mxu1 %vm926_vm5, %v1264_v50  ;;  %v1413_v58 = vpop.permute.xlu1 %1412 }
 0x68b   : > { %2651 = vmatpush3.bf16.xpose.msra.mxu1 %v1370_v51  ;;  %2652 = vmatprep.mubr.msk.bf16.mxu1 %vm2922_vm3, %v2921_v16 }
 0x68c   : > { %2662 = vmatprep.subr.bf16.mxu1 %v2921_v16 }
 0x68d   : > { %v2838_v52 = vpop.eup %2837 }
 0x68e   : > { %v1263_v53 = vmul.f32 %v2838_v52, %v2834_v43 }
 0x690   : > { %v1265_v55 = vpack.c.bf16 %v1263_v53, %v1263_v53 }
 0x692   : > { %2647 = vmatmul.mubr.msk.bf16.vlgmr.msra.gmra.mrb[20].mxu0 %vm926_vm5, %v1265_v55  ;;  %2653 = vmatmul.mubr.msk.bf16.vlgmr.msra.gmra.mrb[12].mxu1 %vm926_vm5, %v1363_v56 }
 0x693   : > { %2657 = vmatpush3.bf16.xpose.msra.mxu0 %v1420_v57  ;;  %2658 = vmatprep.mubr.msk.bf16.mxu0 %vm2922_vm3, %v2921_v16 }
 0x694   : > { %2668 = vmatprep.subr.bf16.mxu0 %v2921_v16  ;;  %2664 = vmatprep.mubr.msk.bf16.mxu1 %vm2922_vm3, %v2921_v16 }
 0x69a   : > { %2659 = vmatmul.mubr.msk.bf16.vlgmr.msra.gmra.mrb[24].mxu0 %vm926_vm5, %v1413_v58 }
 0x69b   : > { %2670 = vmatprep.mubr.msk.bf16.mxu0 %vm2922_vm3, %v2921_v16 }
 0x75d   : > { %v3236_v59 = vpop.f32.mrb[8].mxu1 }
 0x75e   : > { %v2642_v60 = vpop.f32.mrb[9].mxu1 }
 0x75f   : > { %v1311_v61 = vpop.f32.mrb[10].mxu1 }
 0x760   : > { %v2643_v62 = vpop.f32.mrb[11].mxu1 }
 0x765   : > { %v3238_v63 = vpop.f32.mrb[20].mxu0  ;;  %v1406_v0 = vpop.f32.mrb[12].mxu1 }
 0x766   : > { %v2794_v1 = vpack.i.bf16 %v3238_v63, %v3236_v59  ;;  %v2648_v2 = vpop.f32.mrb[21].mxu0  ;;  %v2654_v3 = vpop.f32.mrb[13].mxu1  ;;  %v1462_v4 = vsel %vm926_vm5, %v1406_v0, -inf }
 0x767   : > { %1463 = vmax.xlane.f32.xlu0 %v1462_v4  ;;  %v1359_v5 = vpop.f32.mrb[22].mxu0  ;;  %v1409_v6 = vpop.f32.mrb[14].mxu1 }
 0x768   : > { %v2649_v7 = vpop.f32.mrb[23].mxu0  ;;  %v2655_v9 = vpop.f32.mrb[15].mxu1 }
 0x76d   : > { %v1456_v10 = vpop.f32.mrb[24].mxu0 }
 0x76e   : > { %v2660_v11 = vpop.f32.mrb[25].mxu0  ;;  %v1465_v13 = vsel %vm926_vm5, %v1456_v10, -inf }
 0x76f   : > { %1466 = vmax.xlane.f32.xlu1 %v1465_v13  ;;  %v1459_v14 = vpop.f32.mrb[26].mxu0 }
 0x770   : > { %v2661_v15 = vpop.f32.mrb[27].mxu0 }
 0x780   : > { %1486 = vrot.lane.b32.xlu1 %v3154_v26, %s2930_s6 }
 0x784   : > { %1584 = vrot.lane.b32.xlu1 %v3154_v26, %s2931_s23 }
 0x788   : > { %1634 = vrot.lane.b32.xlu1 %v3157_v29, %s2931_s23  ;;  %s3465_s23 = sld [smem:[#allocation15_spill]] }
 0x78c   : > { %1632 = vrot.lane.b32.xlu1 %v3157_v29, %s2932_s24 }
 0x7f4   : > { %v1464_v17 = vpop.xlane.xlu0 %1463 }
 0x7f5   : > { %v1468_v20 = vsub.f32 %v1406_v0, %v1464_v17 }
 0x7f7   : > { %v1470_v21 = vmul.f32 1.442695, %v1468_v20 }
 0x7f9   : > { %2839 = vpow2.f32 %v1470_v21 }
 0x7fc   : > { %v1467_v22 = vpop.xlane.xlu1 %1466 }
 0x7fd   : > { %v1469_v23 = vsub.f32 %v1456_v10, %v1467_v22 }
 0x7ff   : > { %v1472_v24 = vmul.f32 1.442695, %v1469_v23 }
 0x800   : > { %v1487_v25 = vpop.permute.xlu1 %1486 }
 0x801   : > { %2841 = vpow2.f32 %v1472_v24  ;;  %v1492_v27 = vsel %vm1050_vm6, %v1487_v25, 0 }
 0x802   : > { %2663 = vmatpush3.bf16.msra.mxu1 %v1492_v27 }
 0x803   : > { %v2840_v28 = vpop.eup %2839  ;;  %2674 = vmatprep.subr.bf16.mxu1 %v2921_v16 }
 0x804   : > { %v1474_v30 = vsel %vm926_vm5, %v2840_v28, 0.0  ;;  %v1585_v38 = vpop.permute.xlu1 %1584 }
 0x805   : > { %1475 = vadd.xlane.f32.xlu0 %v1474_v30  ;;  %v1590_v41 = vsel %vm926_vm5, %v1585_v38, 0 }
 0x808   : > { %v1635_v44 = vpop.permute.xlu1 %1634 }
 0x809   : > { %v1640_v47 = vsel %vm926_vm5, %v1635_v44, 0 }
 0x80b   : > { %v2842_v31 = vpop.eup %2841 }
 0x80c   : > { %v1477_v32 = vsel %vm926_vm5, %v2842_v31, 0.0  ;;  %v1633_v48 = vpop.permute.xlu1 %1632 }
 0x80d   : > { %1478 = vadd.xlane.f32.xlu0 %v1477_v32  ;;  %v2812_v32 = vld [vmem:[%s3073_s30 + $0x8] sm:$0xff]  }
 0x823   : > { %1534 = vrot.lane.b32.xlu0 %v3157_v29, %s2930_s6 }
 0x827   : > { %1582 = vrot.lane.b32.xlu0 %v3154_v26, %s2932_s24  ;;  %s3466_s24 = scalar_lea.vmem %s3465_s23, %s3058_s19 }
 0x892   : > { %v1476_v33 = vpop.xlane.xlu0 %1475 }
 0x893   : > { %2843 = vrcp.f32 %v1476_v33 }
 0x89a   : > { %v1479_v34 = vpop.xlane.xlu0 %1478 }
 0x89b   : > { %2845 = vrcp.f32 %v1479_v34 }
 0x89d   : > { %v2844_v35 = vpop.eup %2843 }
 0x89e   : > { %v1482_v36 = vmul.f32 %v2844_v35, %v2840_v28  ;;  %v1535_v37 = vpop.permute.xlu0 %1534 }
 0x89f   : > { %v1540_v39 = vsel %vm1050_vm6, %v1535_v37, 0 }
 0x8a0   : > { %2669 = vmatpush3.bf16.msra.mxu0 %v1540_v39  ;;  %v1484_v40 = vpack.c.bf16 %v1482_v36, %v1482_v36 }
 0x8a1   : > { %2680 = vmatprep.subr.bf16.mxu0 %v2921_v16 }
 0x8a2   : > { %2665 = vmatmul.mubr.msk.bf16.vlgmr.msra.gmra.mrb[16].mxu1 %vm926_vm5, %v1484_v40  ;;  %v1583_v46 = vpop.permute.xlu0 %1582 }
 0x8a3   : > { %2675 = vmatpush3.bf16.xpose.msra.mxu1 %v1590_v41  ;;  %2676 = vmatprep.mubr.msk.bf16.mxu1 %vm2922_vm3, %v2921_v16 }
 0x8a4   : > { %2686 = vmatprep.subr.bf16.mxu1 %v2921_v16 }
 0x8a5   : > { %v2846_v42 = vpop.eup %2845 }
 0x8a6   : > { %v1483_v43 = vmul.f32 %v2846_v42, %v2842_v31  ;;  %v2811_v31 = vld [vmem:[%s3073_s30] sm:$0xff]  }
 0x8a8   : > { %v1485_v45 = vpack.c.bf16 %v1483_v43, %v1483_v43 }
 0x8aa   : > { %2671 = vmatmul.mubr.msk.bf16.vlgmr.msra.gmra.mrb[28].mxu0 %vm926_vm5, %v1485_v45  ;;  %2677 = vmatmul.mubr.msk.bf16.vlgmr.msra.gmra.mrb[20].mxu1 %vm926_vm5, %v1583_v46 }
 0x8ab   : > { %2681 = vmatpush3.bf16.xpose.msra.mxu0 %v1640_v47  ;;  %2682 = vmatprep.mubr.msk.bf16.mxu0 %vm2922_vm3, %v2921_v16 }
 0x8ac   : > { %2692 = vmatprep.subr.bf16.mxu0 %v2921_v16  ;;  %2688 = vmatprep.mubr.msk.bf16.mxu1 %vm2922_vm3, %v2921_v16 }
 0x8b2   : > { %2683 = vmatmul.mubr.msk.bf16.vlgmr.msra.gmra.mrb[32].mxu0 %vm926_vm5, %v1633_v48 }
 0x8b3   : > { %2694 = vmatprep.mubr.msk.bf16.mxu0 %vm2922_vm3, %v2921_v16 }
 0x975   : > { %v1528_v49 = vpop.f32.mrb[16].mxu1 }
 0x976   : > { %v2666_v50 = vpop.f32.mrb[17].mxu1 }
 0x977   : > { %v1531_v51 = vpop.f32.mrb[18].mxu1 }
 0x978   : > { %v2667_v52 = vpop.f32.mrb[19].mxu1 }
 0x97d   : > { %v1576_v53 = vpop.f32.mrb[28].mxu0  ;;  %v1626_v54 = vpop.f32.mrb[20].mxu1 }
 0x97e   : > { %v2799_v55 = vpack.i.bf16 %v1576_v53, %v1528_v49  ;;  %v2672_v56 = vpop.f32.mrb[29].mxu0  ;;  %v2678_v57 = vpop.f32.mrb[21].mxu1  ;;  %v1682_v58 = vsel %vm926_vm5, %v1626_v54, -inf }
 0x97f   : > { %1683 = vmax.xlane.f32.xlu0 %v1682_v58  ;;  %v1579_v60 = vpop.f32.mrb[30].mxu0  ;;  %v1629_v61 = vpop.f32.mrb[22].mxu1 }
 0x980   : > { %v2673_v62 = vpop.f32.mrb[31].mxu0  ;;  %v2679_v0 = vpop.f32.mrb[23].mxu1 }
 0x985   : > { %v1676_v2 = vpop.f32.mrb[32].mxu0 }
 0x986   : > { %v2684_v3 = vpop.f32.mrb[33].mxu0  ;;  %v1685_v4 = vsel %vm926_vm5, %v1676_v2, -inf }
 0x987   : > { %1686 = vmax.xlane.f32.xlu1 %v1685_v4  ;;  %v1679_v5 = vpop.f32.mrb[34].mxu0 }
 0x988   : > { %v2685_v6 = vpop.f32.mrb[35].mxu0 }
 0x998   : > { %1706 = vrot.lane.b32.xlu1 %v3154_v26, %s2933_s28 }
 0x99c   : > { %2795 = vrot.lane.b32.xlu1 %v2794_v1, %s2934_s26 }
 0x9a0   : > { %2800 = vrot.lane.b32.xlu1 %v2799_v55, %s2935_s18 }
 0xa0c   : > { %v1684_v7 = vpop.xlane.xlu0 %1683 }
 0xa0d   : > { %v1688_v9 = vsub.f32 %v1626_v54, %v1684_v7 }
 0xa0f   : > { %v1690_v10 = vmul.f32 1.442695, %v1688_v9 }
 0xa11   : > { %2847 = vpow2.f32 %v1690_v10 }
 0xa14   : > { %v1687_v11 = vpop.xlane.xlu1 %1686 }
 0xa15   : > { %v1689_v13 = vsub.f32 %v1676_v2, %v1687_v11 }
 0xa17   : > { %v1692_v14 = vmul.f32 1.442695, %v1689_v13 }
 0xa18   : > { %v1707_v15 = vpop.permute.xlu1 %1706 }
 0xa19   : > { %2849 = vpow2.f32 %v1692_v14  ;;  %v1712_v17 = vsel %vm1050_vm6, %v1707_v15, 0 }
 0xa1a   : > { %2687 = vmatpush3.bf16.msra.mxu1 %v1712_v17  ;;  %v2813_v17 = vld [vmem:[%s3082_s16] sm:$0xff]  }
 0xa1b   : > { %v2848_v26 = vpop.eup %2847  ;;  %2698 = vmatprep.subr.bf16.mxu1 %v2921_v16 }
 0xa1c   : > { %v1694_v59 = vsel %vm926_vm5, %v2848_v26, 0.0  ;;  %v2796_v42 = vpop.permute.xlu1 %2795 }
 0xa1d   : > { %1695 = vadd.xlane.f32.xlu0 %v1694_v59  ;;  %v2798_v44 = vunpack.i.h.bf16 %v2796_v42  ;;  %v2797_v45 = vunpack.i.l.bf16 %v2796_v42  ;;  %v2815_v59 = vld [vmem:[%s3092_s25] sm:$0xff]   ;;  %v2822_v42 = vld [vmem:[%s3092_s25 + $0x38] sm:$0xff]  }
 0xa1f   : > { %v1827_v49 = vsel %vm926_vm5, %v3204_v12, %v2798_v44  ;;  %v1826_v50 = vsel %vm926_vm5, %v3202_v8, %v2797_v45  ;;  %v2497_v12 = vld [vmem:[%s3464_s20] ss:$0 sm:$0xff]  ;;  %s3468_s20 = sld [smem:[#allocation16_spill]] (!%p2518_p6) }
 0xa20   : > { %v2801_v43 = vpop.permute.xlu1 %2800 }
 0xa21   : > { %v2803_v46 = vunpack.i.h.bf16 %v2801_v43  ;;  %v2802_v47 = vunpack.i.l.bf16 %v2801_v43  ;;  %v2503_v43 = vld [vmem:[%s3466_s24] ss:$0 sm:$0xff] }
 0xa23   : > { %v2850_v63 = vpop.eup %2849  ;;  %v1829_v53 = vsel %vm1828_vm7, %v1826_v50, %v2802_v47  ;;  %v1830_v54 = vsel %vm1828_vm7, %v1827_v49, %v2803_v46 }
 0xa24   : > { %v1697_v1 = vsel %vm926_vm5, %v2850_v63, 0.0 }
 0xa25   : > { %1698 = vadd.xlane.f32.xlu0 %v1697_v1  ;;  %v2817_v1 = vld [vmem:[%s3092_s25 + $0x10] sm:$0xff]  }
 0xa3b   : > { %1754 = vrot.lane.b32.xlu0 %v3157_v29, %s2933_s28 }
 0xaaa   : > { %v1696_v20 = vpop.xlane.xlu0 %1695 }
 0xaab   : > { %2851 = vrcp.f32 %v1696_v20  ;;  %v2818_v20 = vld [vmem:[%s3092_s25 + $0x18] sm:$0xff]  }
 0xab2   : > { %v1699_v21 = vpop.xlane.xlu0 %1698 }
 0xab3   : > { %2853 = vrcp.f32 %v1699_v21  ;;  %v2819_v21 = vld [vmem:[%s3092_s25 + $0x20] sm:$0xff]  }
 0xab5   : > { %v2852_v22 = vpop.eup %2851 }
 0xab6   : > { %v1702_v23 = vmul.f32 %v2852_v22, %v2848_v26  ;;  %v1755_v24 = vpop.permute.xlu0 %1754  ;;  %v2814_v26 = vld [vmem:[%s3082_s16 + $0x8] sm:$0xff]  }
 0xab7   : > { %v1760_v25 = vsel %vm1050_vm6, %v1755_v24, 0  ;;  %v2820_v22 = vld [vmem:[%s3092_s25 + $0x28] sm:$0xff]  }
 0xab8   : > { %2693 = vmatpush3.bf16.msra.mxu0 %v1760_v25  ;;  %v1704_v27 = vpack.c.bf16 %v1702_v23, %v1702_v23 }
 0xab9   : > { %2706 = vmatprep.subr.bf16.mxu0 %v2921_v16 }
 0xaba   : > { %2689 = vmatmul.mubr.msk.bf16.vlgmr.msra.gmra.mrb[24].mxu1 %vm926_vm5, %v1704_v27 }
 0xabb   : > { %2702 = vmatprep.mubr.msk.bf16.mxu1 %vm2922_vm3, %v2921_v16  ;;  %2699 = vmatpush3.bf16.msra.mxu1 %v2811_v31  ;;  %v2501_v31 = vld [vmem:[%s763_s17] ss:$0 sm:$0xff] }
 0xabc   : > { %2700 = vmatprep.subr.bf16.mxu1 %v2921_v16 }
 0xabd   : > { %v2854_v29 = vpop.eup %2853 }
 0xabe   : > { %v1703_v28 = vmul.f32 %v2854_v29, %v2850_v63  ;;  %v2816_v63 = vld [vmem:[%s3092_s25 + $0x8] sm:$0xff]  }
 0xabf   : > { %2701 = vmatpush3.bf16.msra.mxu1 %v2812_v32 }
 0xac0   : > { %v1705_v30 = vpack.c.bf16 %v1703_v28, %v1703_v28  ;;  %2714 = vmatprep.subr.bf16.mxu1 %v2921_v16 }
 0xac2   : > { %2695 = vmatmul.mubr.msk.bf16.vlgmr.msra.gmra.mrb[36].mxu0 %vm926_vm5, %v1705_v30 }
 0xac3   : > { %2710 = vmatprep.mubr.msk.bf16.mxu0 %vm2922_vm3, %v2921_v16  ;;  %2707 = vmatpush3.bf16.msra.mxu0 %v2813_v17 }
 0xac4   : > { %2708 = vmatprep.subr.bf16.mxu0 %v2921_v16 }
 0xac7   : > { %2709 = vmatpush3.bf16.msra.mxu0 %v2814_v26  ;;  %v2516_v26 = vld [vmem:[%s769_s2] ss:$0 sm:$0xff] }
 0xb8d   : > { %v1748_v33 = vpop.f32.mrb[24].mxu1 }
 0xb8e   : > { %v2690_v34 = vpop.f32.mrb[25].mxu1 }
 0xb8f   : > { %v1751_v35 = vpop.f32.mrb[26].mxu1 }
 0xb90   : > { %v2691_v36 = vpop.f32.mrb[27].mxu1 }
 0xb91   : > { %v2502_v36 = vld [vmem:[%s766_s8] ss:$0 sm:$0xff] }
 0xb95   : > { %v1796_v37 = vpop.f32.mrb[36].mxu0 }
 0xb96   : > { %v2804_v38 = vpack.i.bf16 %v1796_v37, %v1748_v33  ;;  %v2696_v39 = vpop.f32.mrb[37].mxu0 }
 0xb97   : > { %v1799_v40 = vpop.f32.mrb[38].mxu0 }
 0xb98   : > { %2805 = vrot.lane.b32.xlu0 %v2804_v38, %s2936_s0  ;;  %v2697_v41 = vpop.f32.mrb[39].mxu0 }
 0xb99   : > { %v2821_v41 = vld [vmem:[%s3092_s25 + $0x30] sm:$0xff]   ;;  %s3467_s25 = scalar_lea.vmem %s3429_s11, %s3058_s19 }
 0xc0a   : > { %v2806_v48 = vpop.permute.xlu0 %2805 }
 0xc0b   : > { %v2808_v51 = vunpack.i.h.bf16 %v2806_v48  ;;  %v2807_v52 = vunpack.i.l.bf16 %v2806_v48 }
 0xc0d   : > { %v1833_v55 = vsel %vm1831_vm8, %v1830_v54, %v2808_v51  ;;  %v1832_v56 = vsel %vm1831_vm8, %v1829_v53, %v2807_v52 }
 0xc0e   : > { %v1834_v57 = vpack.c.bf16 %v1833_v55, %v1832_v56 }
 0xc10   : > { %2703 = vmatmul.mubr.msk.bf16.vlgmr.msra.gmra.mrb[28].mxu1 %vm873_vm4, %v1834_v57 }
 0xc11   : > { %2730 = vmatprep.mubr.msk.bf16.mxu1 %vm2922_vm3, %v2921_v16  ;;  %2715 = vmatpush3.bf16.msra.mxu1 %v2815_v59 }
 0xc12   : > { %2716 = vmatprep.subr.bf16.mxu1 %v2921_v16 }
 0xc15   : > { %2717 = vmatpush3.bf16.msra.mxu1 %v2816_v63 }
 0xc16   : > { %2718 = vmatprep.subr.bf16.mxu1 %v2921_v16 }
 0xc19   : > { %2719 = vmatpush3.bf16.msra.mxu1 %v2817_v1  ;;  %v2517_v1 = vld [vmem:[%s772_s22] ss:$0 sm:$0xff] }
 0xc1a   : > { %2720 = vmatprep.subr.bf16.mxu1 %v2921_v16 }
 0xc1d   : > { %2721 = vmatpush3.bf16.msra.mxu1 %v2818_v20 }
 0xc1e   : > { %2722 = vmatprep.subr.bf16.mxu1 %v2921_v16 }
 0xc21   : > { %2723 = vmatpush3.bf16.msra.mxu1 %v2819_v21 }
 0xc22   : > { %2724 = vmatprep.subr.bf16.mxu1 %v2921_v16 }
 0xc25   : > { %2725 = vmatpush3.bf16.msra.mxu1 %v2820_v22 }
 0xc26   : > { %2726 = vmatprep.subr.bf16.mxu1 %v2921_v16 }
 0xc29   : > { %2727 = vmatpush3.bf16.msra.mxu1 %v2821_v41 }
 0xc2a   : > { %2728 = vmatprep.subr.bf16.mxu1 %v2921_v16  ;;  %v2507_v16 = vld [vmem:[%s3467_s25] ss:$0 sm:$0xff] }
 0xc2d   : > { %2729 = vmatpush3.bf16.msra.mxu1 %v2822_v42 }
 0xce3   : > { %v1895_v58 = vpop.f32.mrb[28].mxu1 }
 0xce4   : > { %v1896_v60 = vadd.f32 %v2497_v12, %v1895_v58  ;;  %v2704_v8 = vpop.f32.mrb[29].mxu1 }
 0xce5   : > { %v1898_v61 = vpop.f32.mrb[30].mxu1 }
 0xce6   : > { %v1899_v62 = vadd.f32 %v2497_v12, %v1898_v61  ;;  %v2705_v0 = vpop.f32.mrb[31].mxu1  ;;  %v1902_v2 = vadd.f32 %v1896_v60, %v3136_v18 }
 0xce8   : > { %v1906_v3 = vsel %vm873_vm4, %v1902_v2, 0.0  ;;  %v1903_v4 = vadd.f32 %v1899_v62, %v3138_v19 }
 0xce9   : > { %1907 = vadd.xlane.f32.xlu1 %v1906_v3 }
 0xcea   : > { %v1909_v5 = vsel %vm873_vm4, %v1903_v4, 0.0 }
 0xceb   : > { %1910 = vadd.xlane.f32.xlu0 %v1909_v5 }
 0xd76   : > { %v1908_v6 = vpop.xlane.xlu1 %1907 }
 0xd77   : > { %v1913_v7 = vmul.f32 0.03125, %v1908_v6 }
 0xd78   : > { %v1911_v9 = vpop.xlane.xlu0 %1910 }
 0xd79   : > { %v1915_v10 = vsub.f32 %v1902_v2, %v1913_v7  ;;  %v1914_v11 = vmul.f32 0.03125, %v1911_v9 }
 0xd7b   : > { %v1916_v13 = vsub.f32 %v1903_v4, %v1914_v11  ;;  %v1917_v14 = vmul.f32 %v1915_v10, %v1915_v10 }
 0xd7d   : > { %v1919_v18 = vsel %vm873_vm4, %v1917_v14, 0.0  ;;  %v1918_v15 = vmul.f32 %v1916_v13, %v1916_v13 }
 0xd7e   : > { %1920 = vadd.xlane.f32.xlu0 %v1919_v18 }
 0xd7f   : > { %v1922_v19 = vsel %vm873_vm4, %v1918_v15, 0.0 }
 0xd80   : > { %1923 = vadd.xlane.f32.xlu1 %v1922_v19 }
 0xe0b   : > { %v1921_v23 = vpop.xlane.xlu0 %1920 }
 0xe0c   : > { %v1925_v24 = vmul.f32 0.03125, %v1921_v23 }
 0xe0d   : > { %v1924_v25 = vpop.xlane.xlu1 %1923 }
 0xe0e   : > { %v1927_v27 = vadd.f32 1e-05, %v1925_v24  ;;  %v1926_v29 = vmul.f32 0.03125, %v1924_v25  ;;  %v2863_v25 = vld [vmem:[%s3468_s20] sm:$0xff] (!%p2518_p6)  }
 0xe10   : > { %2855 = vrsqrt.f32 %v1927_v27  ;;  %v1928_v28 = vadd.f32 1e-05, %v1926_v29  ;;  %v2937_v27 = vmov (!%p2518_p6), 0.0   ;;  %v2864_v29 = vld [vmem:[%s3468_s20 + $0x8] sm:$0xff] (!%p2518_p6)  }
 0xe11   : > { %2734 = vmatprep.subr.bf16.mxu0 (!%p2518_p6), %v2937_v27 }
 0xe12   : > { %2857 = vrsqrt.f32 %v1928_v28 }
 0xe1a   : > { %v2856_v30 = vpop.eup %2855 }
 0xe1b   : > { %v1931_v32 = vmul.f32 %v2856_v30, %v1915_v10 }
 0xe1c   : > { %v2858_v33 = vpop.eup %2857 }
 0xe1d   : > { %v1939_v34 = vmul.f32 %v2501_v31, %v1931_v32  ;;  %v1932_v35 = vmul.f32 %v2858_v33, %v1916_v13 }
 0xe1f   : > { %v1940_v37 = vmul.f32 %v2501_v31, %v1932_v35  ;;  %v1947_v38 = vadd.f32 %v2502_v36, %v1939_v34 }
 0xe21   : > { %v1948_v39 = vadd.f32 %v2502_v36, %v1940_v37 }
 0xe23   : > { %v1949_v40 = vpack.c.bf16 %v1948_v39, %v1947_v38 }
 0xe25   : > { %2711 = vmatmul.mubr.msk.bf16.vlgmr.msra.gmra.mrb[40].mxu0 %vm873_vm4, %v1949_v40 }
 0xe26   : > { %2735 = vmatpush3.bf16.msra.mxu0 (!%p2518_p6), %v2863_v25  ;;  %2738 = vmatprep.mubr.msk.bf16.mxu0 (!%p2518_p6), %vm2938_vm9, %v2937_v27 }
 0xe27   : > { %2736 = vmatprep.subr.bf16.mxu0 (!%p2518_p6), %v2937_v27 }
 0xe2a   : > { %2737 = vmatpush3.bf16.msra.mxu0 (!%p2518_p6), %v2864_v29 }
 0xef8   : > { %v2010_v44 = vpop.f32.mrb[40].mxu0 }
 0xef9   : > { %v2011_v45 = vadd.f32 %v2503_v43, %v2010_v44  ;;  %v2712_v46 = vpop.f32.mrb[41].mxu0 }
 0xefa   : > { %v2013_v47 = vpop.f32.mrb[42].mxu0 }
 0xefb   : > { %v2014_v48 = vadd.f32 %v2503_v43, %v2013_v47  ;;  %v2713_v49 = vpop.f32.mrb[43].mxu0  ;;  %v2017_v50 = vmax.f32 %v2011_v45, 0.0 }
 0xefd   : > { %v2018_v51 = vmax.f32 %v2014_v48, 0.0 }
 0xeff   : > { %v2019_v52 = vpack.c.bf16 %v2018_v51, %v2017_v50  ;;  %v2519_v51 = vld [vmem:[%s3469_s9] ss:$0 sm:$0xff] (!%p2518_p6) }
 0xf01   : > { %2731 = vmatmul.mubr.bf16.vlgmr.msra.gmra.mrb[32].mxu1 %v2019_v52 }
 0xfd4   : > { %v2125_v53 = vpop.f32.mrb[32].mxu1 }
 0xfd5   : > { %v2126_v54 = vadd.f32 %v2507_v16, %v2125_v53  ;;  %v2732_v55 = vpop.f32.mrb[33].mxu1 }
 0xfd6   : > { %v2128_v56 = vpop.f32.mrb[34].mxu1 }
 0xfd7   : > { %v2129_v57 = vadd.f32 %v2507_v16, %v2128_v56  ;;  %v2733_v12 = vpop.f32.mrb[35].mxu1  ;;  %v2132_v58 = vadd.f32 %v2126_v54, %v1947_v38 }
 0xfd9   : > { %v2136_v60 = vsel %vm873_vm4, %v2132_v58, 0.0  ;;  %v2133_v8 = vadd.f32 %v2129_v57, %v1948_v39 }
 0xfda   : > { %2137 = vadd.xlane.f32.xlu0 %v2136_v60 }
 0xfdb   : > { %v2139_v61 = vsel %vm873_vm4, %v2133_v8, 0.0 }
 0xfdc   : > { %2140 = vadd.xlane.f32.xlu1 %v2139_v61 }
0x1067   : > { %v2138_v62 = vpop.xlane.xlu0 %2137 }
0x1068   : > { %v2142_v0 = vmul.f32 0.03125, %v2138_v62 }
0x1069   : > { %v2141_v2 = vpop.xlane.xlu1 %2140 }
0x106a   : > { %v2144_v3 = vsub.f32 %v2132_v58, %v2142_v0  ;;  %v2143_v4 = vmul.f32 0.03125, %v2141_v2 }
0x106c   : > { %v2145_v5 = vsub.f32 %v2133_v8, %v2143_v4  ;;  %v2146_v6 = vmul.f32 %v2144_v3, %v2144_v3 }
0x106e   : > { %v2148_v7 = vsel %vm873_vm4, %v2146_v6, 0.0  ;;  %v2147_v9 = vmul.f32 %v2145_v5, %v2145_v5 }
0x106f   : > { %2149 = vadd.xlane.f32.xlu0 %v2148_v7 }
0x1070   : > { %v2151_v10 = vsel %vm873_vm4, %v2147_v9, 0.0 }
0x1071   : > { %2152 = vadd.xlane.f32.xlu1 %v2151_v10 }
0x10fc   : > { %v2150_v11 = vpop.xlane.xlu0 %2149 }
0x10fd   : > { %v2154_v13 = vmul.f32 0.03125, %v2150_v11 }
0x10fe   : > { %v2153_v14 = vpop.xlane.xlu1 %2152 }
0x10ff   : > { %v2156_v18 = vadd.f32 1e-05, %v2154_v13  ;;  %v2155_v15 = vmul.f32 0.03125, %v2153_v14 }
0x1101   : > { %2859 = vrsqrt.f32 %v2156_v18  ;;  %v2157_v19 = vadd.f32 1e-05, %v2155_v15 }
0x1103   : > { %2861 = vrsqrt.f32 %v2157_v19 }
0x110b   : > { %v2860_v17 = vpop.eup %2859 }
0x110c   : > { %v2160_v59 = vmul.f32 %v2860_v17, %v2144_v3 }
0x110d   : > { %v2862_v63 = vpop.eup %2861 }
0x110e   : > { %v2168_v20 = vmul.f32 %v2516_v26, %v2160_v59  ;;  %v2161_v21 = vmul.f32 %v2862_v63, %v2145_v5  ;;  %2183 = sbr.rel (%p2518_p6) target bundleno = 4609 (0x1201), region = 100 }
0x1110   : > { %v2176_v22 = vadd.f32 %v2517_v1, %v2168_v20  ;;  %v2169_v23 = vmul.f32 %v2516_v26, %v2161_v21 }
0x1112   : > { %2178 = vst.msk [vmem:[#allocation2] sm:$0xff] %vm873_vm4, %v2176_v22  ;;  %v2177_v24 = vadd.f32 %v2517_v1, %v2169_v23  ;;  %v2184_v28 = vsel (!%p2518_p6), %vm873_vm4, %v2176_v22, 0.0 }
0x1113   : > { %v2185_v31 = vrot.slane (!%p2518_p6), %v2184_v28, 4 }
0x1114   : > { %2179 = vst.msk [vmem:[#allocation2 + $0x8] sm:$0xff] %vm873_vm4, %v2177_v24  ;;  %v2191_v30 = vsel (!%p2518_p6), %vm873_vm4, %v2177_v24, 0.0 }
0x1115   : > { %v2192_v32 = vrot.slane %v2191_v30, 4  ;;  %v2186_v33 = vadd.f32 %v2185_v31, %v2184_v28 }
0x1117   : > { %v2193_v34 = vadd.f32 %v2192_v32, %v2191_v30  ;;  %v2187_v35 = vrot.slane %v2186_v33, 2 }
0x1119   : > { %v2194_v36 = vrot.slane %v2193_v34, 2  ;;  %v2188_v37 = vadd.f32 %v2187_v35, %v2186_v33 }
0x111b   : > { %v2195_v38 = vadd.f32 %v2194_v36, %v2193_v34  ;;  %v2189_v39 = vrot.slane %v2188_v37, 1 }
0x111d   : > { %v2196_v40 = vrot.slane %v2195_v38, 1  ;;  %v2190_v41 = vadd.f32 %v2189_v39, %v2188_v37 }
0x111f   : > { %v2197_v42 = vadd.f32 %v2196_v40, %v2195_v38  ;;  %v2198_v43 = vmul.f32 0.125, %v2190_v41 }
0x1121   : > { %v2199_v44 = vmul.f32 0.125, %v2197_v42  ;;  %v2200_v45 = vpack.c.bf16 %v2198_v43, %v2198_v43 }
0x1123   : > { %v2201_v46 = vpack.c.bf16 %v2199_v44, %v2199_v44  ;;  %v2215_v47 = vunpack.c.l.b16 %v2200_v45 }
0x1125   : > { %v2216_v48 = vunpack.c.l.b16 %v2201_v46 }
0x1127   : > { %v2218_v49 = vsel %vm2217_vm10, %v2216_v48, %v2215_v47 }
0x1128   : > { %v2219_v50 = vpack.c.b16 %v2218_v49, %v2218_v49 }
0x112a   : > { %2739 = vmatmul.mubr.msk.bf16.vlgmr.msra.gmra.mrb[0].mxu0 %vm873_vm4, %v2219_v50 }
0x11fd   : > { %v2269_v52 = vpop.f32.mrb[0].mxu0 }
0x11fe   : > { %v2270_v16 = vadd.f32 %v2519_v51, %v2269_v52  ;;  %v2740_v53 = vpop.f32.mrb[1].mxu0 }
0x11ff   : > { %v2272_v54 = vpop.f32.mrb[2].mxu0 }
0x1200   : > { %2275 = vst [vmem:[#allocation3] sm:$0x3] %v2270_v16  ;;  %v2741_v55 = vpop.f32.mrb[3].mxu0 }
0x1201 PF: > { %s3470_s21 = sld [smem:[#allocation7_spill]]  ;;  %s2939_s6 = smov [#allocation3]  }
0x1202   : > { %s2285_s23 = sshll.u32 %s2939_s6, 4  ;;  %s2286_s23 = int_to_ptr.vmem [resolvable:$true] %s2285_s23 }
0x1203   : > { %s2865_s24 = scalar_lea.vmem %s2286_s23, 32  ;;  %p2872_p11 = scmp.lt.s32.totalorder %s2286_s23, %s2286_s23 }
0x1204   : > { %p2866_p8 = scmp.ne.s32.totalorder %s2286_s23, %s2865_s24  ;;  %p2873_p12 = scmp.lt.s32.totalorder %s2865_s24, %s2865_s24 }
0x1206   : > { %p2874_p13 = por %p2873_p12, %p2872_p11 }
0x1207   : > { %s3471_s4 = sadd.s32 4294967295, %s3470_s21  }
0x1208   : > { %p3383_p7 = scmp.eq.s32.totalorder %s3471_s4, 1 }
0x120a   : > { %p2867_p9 = pnand %p2866_p8, %p3383_p7 }
0x120c   : > { %p2868_p10 = pneg %p2867_p9 }
0x120e   : > { %p2875_p0 = pnand %p2874_p13, %p2868_p10 }
0x1210   : > { %2878 = shalt.err (!%p2875_p0)
}
0x1211   : > { %s3473_s25 = sld [smem:[#allocation18_spill]] }
0x1217   : > { %s2879_s26 = scalar_lea.hbm %s3473_s25, 32 }
0x1218   : > { %p2880_p1 = scmp.ne.s32.totalorder %s3473_s25, %s2879_s26  ;;  %p2885_p4 = scmp.lt.u32.totalorder %s2879_s26, %s3473_s25 }
0x121a   : > { %p2881_p2 = pnand %p2880_p1, %p3383_p7 }
0x121c   : > { %p2882_p3 = pneg %p2881_p2 }
0x121e   : > { %p2887_p5 = pnand %p2885_p4, %p2882_p3 }
0x1220   : > { %2890 = shalt.err (!%p2887_p5)
}
0x1221   : > { %2743 = dma.vmem_to_hbm [thread:$0]  (%p3383_p7), %s2286_s23, 32, %s3473_s25, [#allocation4]  }
0x1222   : > { %2904 = dma.done.wait (%p3383_p7), [#allocation4], 32  }
0x1223   : > { %2906 = vsyncadd (%p3383_p7), [#allocation4], 4294967264 }
0x1224 PF: > { %s3474_s22 = sld [smem:[#allocation7_spill]]  ;;  %s3475_s27 = sld [smem:[#allocation6_spill]] }
0x1225   : > { %s3476_s28 = sld [smem:[#allocation8_spill]] }
0x122a   : > { %s29_s29 = sadd.s32 1, %s3474_s22  }
0x122b   : > { %p26_p6 = scmp.ge.s32.totalorder %s29_s29, 4  }
0x122d   :  { %28 = sbr.rel (!%p26_p6) target bundleno = 13 (0xd), region = 164 }
0x1234   :  { %2298 = vsyncpa [#allocation4], 1 }
0x1235   :  { %2300 = vsyncpa [#allocation4 + $0x1], 1 }

</bundles_post_ra>
